<compile_context>
chip_gen: v7x
topology: tpu7x:2x2x1
jax: 0.10.0
libtpu: 0.0.40
codegen_flags: <defaults>
</compile_context>

<pallas_src>
import functools
import math

import jax
import jax.numpy as jnp
from jax.experimental import pallas as pl
from jax.experimental.pallas import tpu as pltpu


# ---------------------------------------------------------------------------
# Kernel helpers
# ---------------------------------------------------------------------------
def _gelu_exact(x):
    # PyTorch nn.GELU default = exact erf formulation.
    return 0.5 * x * (1.0 + jax.lax.erf(x * (1.0 / math.sqrt(2.0))))


def _ln_normalize(x, eps=1e-5):
    # LayerNorm statistics depend only on x (not gamma/beta), so compute xhat once
    # per residual input and reuse across all P parallel branches.
    mu = jnp.mean(x, axis=-1, keepdims=True)
    xc = x - mu
    var = jnp.mean(xc * xc, axis=-1, keepdims=True)
    return xc * jax.lax.rsqrt(var + eps)


# ---------------------------------------------------------------------------
# Kernel
# ---------------------------------------------------------------------------
def parallel_block_kernel(
    x_ref,
    ln1_g_ref, ln1_b_ref,
    wqkv_ref, wproj_ref, bproj_ref,
    ln2_g_ref, ln2_b_ref,
    w1_ref, b1_ref, w2_ref, b2_ref,
    o_ref,
    head_scr,                       # VMEM (M, C) bf16 head-assembly scratch
    *, num_parallel, num_heads,
):
    TB, N, C = x_ref.shape
    hd = C // num_heads
    M = TB * N

    # Flatten the TB whole sequences of this tile into an (M, C) token matrix.
    x2d = x_ref[...].astype(jnp.float32).reshape(M, C)

    # ---- P parallel [LN -> Attention] branches, summed into the residual ----
    xhat = _ln_normalize(x2d)                               # stats hoisted (once)
    attn_sum = jnp.zeros((M, C), jnp.float32)
    for p in range(num_parallel):                           # static unroll (P small)
        y = (xhat * ln1_g_ref[p:p + 1, :] + ln1_b_ref[p:p + 1, :]).astype(jnp.bfloat16)
        # Fused QKV: one (M,C)x(C,3C) bf16 MXU matmul with f32 accumulation.  The
        # 1/sqrt(hd) scale is folded into the Q columns of wqkv in the wrapper, so
        # the result can be kept bf16 without an extra VPU multiply.
        qkv = jnp.dot(y, wqkv_ref[p],
                      preferred_element_type=jnp.float32).astype(jnp.bfloat16)
        qkv = qkv.reshape(TB, N, 3 * C)                     # split rows only

        # TODO(synk): if MLIR shows lane rotations from the hd-offset slices below,
        # reorder the packed wqkv columns so hot slices land on 128-lane boundaries.
        for h in range(num_heads):                          # static unroll over heads
            lo = h * hd
            q_h = qkv[:, :, lo:lo + hd]
            k_h = qkv[:, :, C + lo:C + lo + hd]
            v_h = qkv[:, :, 2 * C + lo:2 * C + lo + hd]

            # Batched over the TB whole sequences of this tile; attention never
            # crosses samples.
            s = jnp.einsum("bqd,bkd->bqk", q_h, k_h,
                           preferred_element_type=jnp.float32)     # (TB,N,N) f32
            s = s - jnp.max(s, axis=-1, keepdims=True)
            e = jnp.exp(s)
            a = e * pl.reciprocal(jnp.sum(e, axis=-1, keepdims=True), approx=True)
            o_h = jnp.einsum("bqk,bkd->bqd", a.astype(jnp.bfloat16), v_h,
                             preferred_element_type=jnp.float32)   # (TB,N,hd) f32
            # Stage this head's output into its lane slice of the bf16 scratch so
            # the output projection is ONE dense (M,C)x(C,C) MXU matmul per branch
            # instead of num_heads low-fill (K=hd) matmuls.
            head_scr[:, lo:lo + hd] = o_h.reshape(M, hd).astype(jnp.bfloat16)

        attn_sum = (attn_sum
                    + jnp.dot(head_scr[...], wproj_ref[p],
                              preferred_element_type=jnp.float32)
                    + bproj_ref[p:p + 1, :])

    x1 = x2d + attn_sum

    # ---- P parallel [LN -> MLP(GELU)] branches, summed into the residual ----
    x1hat = _ln_normalize(x1)                               # stats hoisted (once)
    ffn_sum = jnp.zeros((M, C), jnp.float32)
    for p in range(num_parallel):
        y = (x1hat * ln2_g_ref[p:p + 1, :] + ln2_b_ref[p:p + 1, :]).astype(jnp.bfloat16)
        h1 = jnp.dot(y, w1_ref[p], preferred_element_type=jnp.float32)  # (M,H) f32
        h1 = _gelu_exact(h1 + b1_ref[p:p + 1, :])
        o = jnp.dot(h1.astype(jnp.bfloat16), w2_ref[p],
                    preferred_element_type=jnp.float32)                  # (M,C) f32
        ffn_sum = ffn_sum + o + b2_ref[p:p + 1, :]

    o_ref[...] = (x1 + ffn_sum).reshape(TB, N, C).astype(o_ref.dtype)


# ---------------------------------------------------------------------------
# One-time capability / hardware queries (cached, outside the hot path)
# ---------------------------------------------------------------------------
def _vmem_capacity_bytes():
    try:
        return int(pltpu.get_tpu_info().vmem_capacity_bytes)
    except Exception:  # noqa: BLE001 - conservative fallback (v7x per-TC)
        return 64 << 20


@functools.lru_cache(maxsize=1)
def _single_buffer_weights_supported():
    """Cached, one-time probe: can grid-invariant weight specs use pl.Buffered(1)?"""
    def _probe(w_ref, o_ref):
        o_ref[...] = w_ref[...]
    try:
        fn = pl.pallas_call(
            _probe,
            out_shape=jax.ShapeDtypeStruct((8, 128), jnp.float32),
            grid=(2,),
            in_specs=[pl.BlockSpec((8, 128), lambda i: (0, 0),
                                   pipeline_mode=pl.Buffered(1))],
            out_specs=pl.BlockSpec((8, 128), lambda i: (0, 0)),
        )
        jax.block_until_ready(fn(jnp.zeros((8, 128), jnp.float32)))
        return True
    except Exception:  # noqa: BLE001 - capability probe only
        return False


# ---------------------------------------------------------------------------
# Cached pallas_call builder (no retrace / rebuild per call)
# ---------------------------------------------------------------------------
@functools.lru_cache(maxsize=None)
def _build_block_call(B, N, C, H, P, num_heads, TB, x_dtype_name, single_buf):
    x_dtype = jnp.dtype(x_dtype_name)
    M = TB * N
    grid = (B // TB,)

    kernel = functools.partial(parallel_block_kernel,
                               num_parallel=P, num_heads=num_heads)

    def wspec(shape):
        rank = len(shape)
        idx = lambda i, _r=rank: (0,) * _r              # grid-invariant block
        if single_buf:
            # Weights never change across grid steps -> one pipeline buffer.  This
            # is the difference between fitting and not fitting 64 MiB on v7x at
            # real ViT sizes.
            return pl.BlockSpec(shape, idx, pipeline_mode=pl.Buffered(1))
        return pl.BlockSpec(shape, idx)

    in_specs = [
        pl.BlockSpec((TB, N, C), lambda i: (i, 0, 0)),   # x: TB whole sequences/step
        wspec((P, C)), wspec((P, C)),                    # ln1 gamma / beta
        wspec((P, C, 3 * C)),                            # fused Wqkv (scale folded)
        wspec((P, C, C)), wspec((P, C)),                 # Wproj, bproj
        wspec((P, C)), wspec((P, C)),                    # ln2 gamma / beta
        wspec((P, C, H)), wspec((P, H)),                 # W1, b1
        wspec((P, H, C)), wspec((P, C)),                 # W2, b2
    ]

    # --- VMEM budget: resident weights + pipelined IO tiles + intermediates ---
    weight_bytes = (4 * P * C * 4                        # LN gammas/betas (f32)
                    + P * C * 3 * C * 2                  # Wqkv  (bf16)
                    + P * C * C * 2 + P * C * 4          # Wproj (bf16), bproj (f32)
                    + P * C * H * 2 + P * H * 4          # W1 (bf16), b1 (f32)
                    + P * H * C * 2 + P * C * 4)         # W2 (bf16), b2 (f32)
    io_tile_bytes = TB * N * C * x_dtype.itemsize
    interm_bytes = (M * 3 * C * 2                        # bf16 qkv
                    + M * H * 4                          # f32 h1
                    + TB * N * N * 4                     # f32 per-head scores
                    + 8 * M * C * 4                      # f32 x2d/xhat/sums/x1/...
                    + M * C * 2)                         # bf16 head scratch
    need = ((1 if single_buf else 2) * weight_bytes
            + 4 * io_tile_bytes + interm_bytes + (4 << 20))
    cap = _vmem_capacity_bytes()
    vmem_limit = int(min(cap - (8 << 20), max(need, 32 << 20)))

    # Advisory cost estimate so XLA overlaps neighbouring ops with this call.
    flops = int(B * N * P * (8 * C * C + 4 * C * H + 4 * N * C))
    transcendentals = int(B * P * num_heads * N * N + B * N * P * H)
    bytes_accessed = int(2 * B * N * C * x_dtype.itemsize + weight_bytes)

    # NOTE: output last dim C should be a multiple of 128 for lane-dense stores at
    # production sizes (768/1024 already are); the toy C=32 uses masked vst.
    return pl.pallas_call(
        kernel,
        out_shape=jax.ShapeDtypeStruct((B, N, C), x_dtype),
        grid=grid,
        in_specs=in_specs,
        out_specs=pl.BlockSpec((TB, N, C), lambda i: (i, 0, 0)),
        scratch_shapes=[pltpu.VMEM((M, C), jnp.bfloat16)],
        compiler_params=pltpu.CompilerParams(
            dimension_semantics=("parallel",),
            vmem_limit_bytes=vmem_limit,
        ),
        cost_estimate=pl.CostEstimate(
            flops=flops, transcendentals=transcendentals,
            bytes_accessed=bytes_accessed),
    )


# ---------------------------------------------------------------------------
# Wrapper
# ---------------------------------------------------------------------------
def _default_target_rows():
    # Smaller M on the 64 MiB-VMEM chips (v7x); larger on 128 MiB (v5e/v6e).
    return 256 if _vmem_capacity_bytes() <= (64 << 20) else 512


def _pick_batch_tile(B, N, C, itemsize, target_rows, max_tile_bytes=16 << 20):
    # Attention needs whole sequences, so a "row tile" is TB whole sequences of N
    # tokens.  Keep at least 2 grid steps so ("parallel",) can shard across both
    # v7x TensorCores.
    max_tb = max(1, B // 2)
    best = 1
    for tb in range(1, max_tb + 1):
        if B % tb:
            continue
        if tb * N * C * itemsize > max_tile_bytes:
            break
        best = tb
        if tb * N >= target_rows:
            break
    return best


def parallel_things_block(x, params, *, num_heads, num_parallel, batch_tile=None):
    B, N, C = x.shape
    P = num_parallel
    assert C % num_heads == 0
    H = params["w1"].shape[-1]
    hd = C // num_heads
    scale = hd ** -0.5

    # Matmul weights cast to bf16 for the MXU.  Q|K|V fused along the output dim,
    # with the attention scale folded into the Q columns (removes an (M,C) VPU
    # multiply per branch and lets the fused-QKV result stay bf16).
    wqkv = jnp.concatenate(
        [params["wq"] * scale, params["wk"], params["wv"]],
        axis=-1).astype(jnp.bfloat16)
    wproj = params["wproj"].astype(jnp.bfloat16)
    w1 = params["w1"].astype(jnp.bfloat16)
    w2 = params["w2"].astype(jnp.bfloat16)
    # LayerNorm params and biases stay in f32.
    ln1_g = params["ln1_g"].astype(jnp.float32)
    ln1_b = params["ln1_b"].astype(jnp.float32)
    ln2_g = params["ln2_g"].astype(jnp.float32)
    ln2_b = params["ln2_b"].astype(jnp.float32)
    bproj = params["bproj"].astype(jnp.float32)
    b1 = params["b1"].astype(jnp.float32)
    b2 = params["b2"].astype(jnp.float32)

    if batch_tile is None:
        TB = _pick_batch_tile(B, N, C, x.dtype.itemsize, _default_target_rows())
    else:
        TB = batch_tile
    assert B % TB == 0

    single_buf = _single_buffer_weights_supported()    # cached, one-time probe
    call = _build_block_call(B, N, C, H, P, num_heads, TB,
                             jnp.dtype(x.dtype).name, single_buf)

    # TODO(synk): for ViT-L-class sizes on v7x (64 MiB VMEM), stream W1/W2 in
    # H-chunks with pltpu.emit_pipeline instead of keeping full MLP weights resident.
    return call(x, ln1_g, ln1_b, wqkv, wproj, bproj,
                ln2_g, ln2_b, w1, b1, w2, b2)


# ---------------------------------------------------------------------------
# Pure-JAX reference (f32) for correctness check
# ---------------------------------------------------------------------------
def reference(x, params, *, num_heads, num_parallel):
    def ln(z, g, b):
        mu = z.mean(-1, keepdims=True)
        var = ((z - mu) ** 2).mean(-1, keepdims=True)
        return (z - mu) * jax.lax.rsqrt(var + 1e-5) * g + b

    B, N, C = x.shape
    hd = C // num_heads
    scale = 1.0 / math.sqrt(hd)

    attn_sum = jnp.zeros_like(x)
    for p in range(num_parallel):
        y = ln(x, params["ln1_g"][p], params["ln1_b"][p])
        q = (y @ params["wq"][p]).reshape(B, N, num_heads, hd).transpose(0, 2, 1, 3)
        k = (y @ params["wk"][p]).reshape(B, N, num_heads, hd).transpose(0, 2, 1, 3)
        v = (y @ params["wv"][p]).reshape(B, N, num_heads, hd).transpose(0, 2, 1, 3)
        s = jnp.einsum("bhqd,bhkd->bhqk", q * scale, k)
        a = jax.nn.softmax(s, axis=-1)
        o = jnp.einsum("bhqk,bhkd->bhqd", a, v)
        o = o.transpose(0, 2, 1, 3).reshape(B, N, C)
        attn_sum = attn_sum + o @ params["wproj"][p] + params["bproj"][p]
    x1 = x + attn_sum

    ffn_sum = jnp.zeros_like(x1)
    for p in range(num_parallel):
        y = ln(x1, params["ln2_g"][p], params["ln2_b"][p])
        h = y @ params["w1"][p] + params["b1"][p]
        h = 0.5 * h * (1.0 + jax.lax.erf(h / math.sqrt(2.0)))
        ffn_sum = ffn_sum + h @ params["w2"][p] + params["b2"][p]
    return x1 + ffn_sum


# ---------------------------------------------------------------------------
# Main
# ---------------------------------------------------------------------------
if __name__ == "__main__":
    # Small shapes implied by the forward: x is (B, N, C)
    B, N, C = 2, 8, 32
    num_heads = 4
    num_parallel = 2
    mlp_ratio = 4.0
    H = int(C * mlp_ratio)
    P = num_parallel

    key = jax.random.PRNGKey(0)
    keys = jax.random.split(key, 16)

    def nrm(k, shape, s=0.02):
        return (s * jax.random.normal(k, shape)).astype(jnp.float32)

    params = {
        "ln1_g": 1.0 + nrm(keys[0], (P, C), 0.1),
        "ln1_b": nrm(keys[1], (P, C), 0.1),
        "wq": nrm(keys[2], (P, C, C)),
        "wk": nrm(keys[3], (P, C, C)),
        "wv": nrm(keys[4], (P, C, C)),
        "wproj": nrm(keys[5], (P, C, C)),
        "bproj": nrm(keys[6], (P, C), 0.1),
        "ln2_g": 1.0 + nrm(keys[7], (P, C), 0.1),
        "ln2_b": nrm(keys[8], (P, C), 0.1),
        "w1": nrm(keys[9], (P, C, H)),
        "b1": nrm(keys[10], (P, H), 0.1),
        "w2": nrm(keys[11], (P, H, C)),
        "b2": nrm(keys[12], (P, C), 0.1),
    }

    x = jax.random.normal(keys[13], (B, N, C), dtype=jnp.float32)

    out = parallel_things_block(
        x, params, num_heads=num_heads, num_parallel=num_parallel)
    out = jax.block_until_ready(out)

    ref = reference(x, params, num_heads=num_heads, num_parallel=num_parallel)
    ref = jax.block_until_ready(ref)

    assert out.shape == (B, N, C), out.shape
    # bf16 matmul operands (f32 accumulation) + approx softmax reciprocal ->
    # relaxed tolerance vs the f32 reference.
    max_err = float(jnp.abs(out - ref).max())
    assert jnp.allclose(out, ref, atol=2e-2, rtol=2e-2), max_err

    print("KERNEL_OK")
</pallas_src>

<mosaic_0001>
module attributes {stable_mosaic.version = 11 : i64} {
  func.func @_probe(%arg0: i32, %arg1: memref<8x128xf32, #tpu.memory_space<vmem>>, %arg2: memref<8x128xf32, #tpu.memory_space<vmem>>) attributes {dimension_semantics = [#tpu.dimension_semantics<arbitrary>], iteration_bounds = array<i64: 2>, scalar_prefetch = 0 : i64, scratch_operands = 0 : i64, tpu.core_type = #tpu.core_type<tc>, window_params = [{pipeline_mode = #tpu.pipeline_mode<synchronous>, transform_indices = @transform_0, window_bounds = array<i64: 8, 128>}, {pipeline_mode = #tpu.pipeline_mode<synchronous>, transform_indices = @transform_1, window_bounds = array<i64: 8, 128>}]} {
    %c0 = arith.constant 0 : index
    %c0_0 = arith.constant 0 : index
    %0 = vector.load %arg1[%c0, %c0_0] : memref<8x128xf32, #tpu.memory_space<vmem>>, vector<8x128xf32>
    %c0_1 = arith.constant 0 : index
    %c0_2 = arith.constant 0 : index
    %1 = vector.load %arg2[%c0_1, %c0_2] : memref<8x128xf32, #tpu.memory_space<vmem>>, vector<8x128xf32>
    tpu.vector_store %arg2[%c0_1, %c0_2], %0 {strides = array<i32>} : memref<8x128xf32, #tpu.memory_space<vmem>>, vector<8x128xf32>,
    return
  }
  func.func @transform_0(%arg0: i32) -> (i32, i32) {
    %c0_i32 = arith.constant 0 : i32
    %c0_i32_0 = arith.constant 0 : i32
    %c0_i32_1 = arith.constant 0 : i32
    return %c0_i32, %c0_i32_0 : i32, i32
  }
  func.func @transform_1(%arg0: i32) -> (i32, i32) {
    %c0_i32 = arith.constant 0 : i32
    %c0_i32_0 = arith.constant 0 : i32
    %c0_i32_1 = arith.constant 0 : i32
    return %c0_i32, %c0_i32_0 : i32, i32
  }
}

module attributes {stable_mosaic.version = 11 : i64} {
  func.func @parallel_block_kernel(%arg0: i32, %arg1: memref<1x8x32xf32, #tpu.memory_space<vmem>>, %arg2: memref<2x32xf32, #tpu.memory_space<vmem>>, %arg3: memref<2x32xf32, #tpu.memory_space<vmem>>, %arg4: memref<2x32x96xbf16, #tpu.memory_space<vmem>>, %arg5: memref<2x32x32xbf16, #tpu.memory_space<vmem>>, %arg6: memref<2x32xf32, #tpu.memory_space<vmem>>, %arg7: memref<2x32xf32, #tpu.memory_space<vmem>>, %arg8: memref<2x32xf32, #tpu.memory_space<vmem>>, %arg9: memref<2x32x128xbf16, #tpu.memory_space<vmem>>, %arg10: memref<2x128xf32, #tpu.memory_space<vmem>>, %arg11: memref<2x128x32xbf16, #tpu.memory_space<vmem>>, %arg12: memref<2x32xf32, #tpu.memory_space<vmem>>, %arg13: memref<1x8x32xf32, #tpu.memory_space<vmem>>, %arg14: memref<8x32xbf16, #tpu.memory_space<vmem>>) attributes {dimension_semantics = [#tpu.dimension_semantics<parallel>], iteration_bounds = array<i64: 2>, scalar_prefetch = 0 : i64, scratch_operands = 1 : i64, tpu.core_type = #tpu.core_type<tc>, window_params = [{transform_indices = @transform_0, window_bounds = array<i64: 1, 8, 32>}, {pipeline_mode = #tpu.pipeline_mode<synchronous>, transform_indices = @transform_1, window_bounds = array<i64: 2, 32>}, {pipeline_mode = #tpu.pipeline_mode<synchronous>, transform_indices = @transform_2, window_bounds = array<i64: 2, 32>}, {pipeline_mode = #tpu.pipeline_mode<synchronous>, transform_indices = @transform_3, window_bounds = array<i64: 2, 32, 96>}, {pipeline_mode = #tpu.pipeline_mode<synchronous>, transform_indices = @transform_4, window_bounds = array<i64: 2, 32, 32>}, {pipeline_mode = #tpu.pipeline_mode<synchronous>, transform_indices = @transform_5, window_bounds = array<i64: 2, 32>}, {pipeline_mode = #tpu.pipeline_mode<synchronous>, transform_indices = @transform_6, window_bounds = array<i64: 2, 32>}, {pipeline_mode = #tpu.pipeline_mode<synchronous>, transform_indices = @transform_7, window_bounds = array<i64: 2, 32>}, {pipeline_mode = #tpu.pipeline_mode<synchronous>, transform_indices = @transform_8, window_bounds = array<i64: 2, 32, 128>}, {pipeline_mode = #tpu.pipeline_mode<synchronous>, transform_indices = @transform_9, window_bounds = array<i64: 2, 128>}, {pipeline_mode = #tpu.pipeline_mode<synchronous>, transform_indices = @transform_10, window_bounds = array<i64: 2, 128, 32>}, {pipeline_mode = #tpu.pipeline_mode<synchronous>, transform_indices = @transform_11, window_bounds = array<i64: 2, 32>}, {transform_indices = @transform_12, window_bounds = array<i64: 1, 8, 32>}]} {
    %c0 = arith.constant 0 : index
    %c0_0 = arith.constant 0 : index
    %c0_1 = arith.constant 0 : index
    %0 = vector.load %arg1[%c0, %c0_0, %c0_1] : memref<1x8x32xf32, #tpu.memory_space<vmem>>, vector<1x8x32xf32>
    %1 = vector.shape_cast %0 : vector<1x8x32xf32> to vector<8x32xf32>
    %cst = arith.constant dense<0.000000e+00> : vector<8xf32>
    %2 = vector.multi_reduction <add>, %1, %cst [1] : vector<8x32xf32> to vector<8xf32>
    %3 = vector.shape_cast %2 : vector<8xf32> to vector<8x1xf32>
    %cst_2 = arith.constant 3.200000e+01 : f32
    %4 = vector.broadcast %cst_2 : f32 to vector<8x1xf32>
    %5 = arith.divf %3, %4 : vector<8x1xf32>
    %6 = vector.broadcast %5 : vector<8x1xf32> to vector<8x32xf32>
    %7 = arith.subf %1, %6 : vector<8x32xf32>
    %8 = arith.mulf %7, %7 : vector<8x32xf32>
    %cst_3 = arith.constant dense<0.000000e+00> : vector<8xf32>
    %9 = vector.multi_reduction <add>, %8, %cst_3 [1] : vector<8x32xf32> to vector<8xf32>
    %10 = vector.shape_cast %9 : vector<8xf32> to vector<8x1xf32>
    %cst_4 = arith.constant 3.200000e+01 : f32
    %11 = vector.broadcast %cst_4 : f32 to vector<8x1xf32>
    %12 = arith.divf %10, %11 : vector<8x1xf32>
    %cst_5 = arith.constant 9.99999974E-6 : f32
    %13 = vector.broadcast %cst_5 : f32 to vector<8x1xf32>
    %14 = arith.addf %12, %13 : vector<8x1xf32>
    %15 = math.rsqrt %14 : vector<8x1xf32>
    %16 = vector.broadcast %15 : vector<8x1xf32> to vector<8x32xf32>
    %17 = arith.mulf %7, %16 : vector<8x32xf32>
    %cst_6 = arith.constant 0.000000e+00 : f32
    %18 = vector.broadcast %cst_6 : f32 to vector<8x32xf32>
    %c0_7 = arith.constant 0 : index
    %c0_8 = arith.constant 0 : index
    %19 = vector.load %arg2[%c0_7, %c0_8] : memref<2x32xf32, #tpu.memory_space<vmem>>, vector<1x32xf32>
    %20 = vector.broadcast %19 : vector<1x32xf32> to vector<8x32xf32>
    %21 = arith.mulf %17, %20 : vector<8x32xf32>
    %c0_9 = arith.constant 0 : index
    %c0_10 = arith.constant 0 : index
    %22 = vector.load %arg3[%c0_9, %c0_10] : memref<2x32xf32, #tpu.memory_space<vmem>>, vector<1x32xf32>
    %23 = vector.broadcast %22 : vector<1x32xf32> to vector<8x32xf32>
    %24 = arith.addf %21, %23 : vector<8x32xf32>
    %25 = arith.truncf %24 : vector<8x32xf32> to vector<8x32xbf16>
    %c0_11 = arith.constant 0 : index
    %c0_12 = arith.constant 0 : index
    %c0_13 = arith.constant 0 : index
    %26 = vector.load %arg4[%c0_11, %c0_12, %c0_13] : memref<2x32x96xbf16, #tpu.memory_space<vmem>>, vector<1x32x96xbf16>
    %27 = vector.shape_cast %26 : vector<1x32x96xbf16> to vector<32x96xbf16>
    %cst_14 = arith.constant dense<0.000000e+00> : vector<8x96xf32>
    %28 = tpu.matmul %25, %27, %cst_14 {dimension_numbers = #tpu.dot_dimension_numbers<[1], [0], [0], [1], [0, 0, 1, 1], [], []>} : vector<8x32xbf16>, vector<32x96xbf16>, vector<8x96xf32> -> vector<8x96xf32>
    %29 = arith.truncf %28 : vector<8x96xf32> to vector<8x96xbf16>
    %30 = vector.shape_cast %29 : vector<8x96xbf16> to vector<1x8x96xbf16>
    %31 = vector.extract_strided_slice %30 {offsets = [0, 0, 0], sizes = [1, 8, 8], strides = [1, 1, 1]} : vector<1x8x96xbf16> to vector<1x8x8xbf16>
    %32 = vector.extract_strided_slice %30 {offsets = [0, 0, 32], sizes = [1, 8, 8], strides = [1, 1, 1]} : vector<1x8x96xbf16> to vector<1x8x8xbf16>
    %33 = vector.extract_strided_slice %30 {offsets = [0, 0, 64], sizes = [1, 8, 8], strides = [1, 1, 1]} : vector<1x8x96xbf16> to vector<1x8x8xbf16>
    "tpu.trace_start"() <{level = 10 : i32, message = "bqd,bkd->bqk"}> : () -> ()
    %cst_15 = arith.constant dense<0.000000e+00> : vector<1x8x8xf32>
    %34 = tpu.matmul %31, %32, %cst_15 {dimension_numbers = #tpu.dot_dimension_numbers<[2], [2], [1], [1], [0, 0, 0, 1, 1, 1], [0], [0]>} : vector<1x8x8xbf16>, vector<1x8x8xbf16>, vector<1x8x8xf32> -> vector<1x8x8xf32>
    "tpu.trace_stop"() : () -> ()
    %cst_16 = arith.constant dense<0xFF800000> : vector<1x8xf32>
    %35 = vector.multi_reduction <maximumf>, %34, %cst_16 [2] : vector<1x8x8xf32> to vector<1x8xf32>
    %36 = vector.shape_cast %35 : vector<1x8xf32> to vector<1x8x1xf32>
    %37 = vector.broadcast %36 : vector<1x8x1xf32> to vector<1x8x8xf32>
    %38 = arith.subf %34, %37 : vector<1x8x8xf32>
    %39 = math.exp %38 : vector<1x8x8xf32>
    %cst_17 = arith.constant dense<0.000000e+00> : vector<1x8xf32>
    %40 = vector.multi_reduction <add>, %39, %cst_17 [2] : vector<1x8x8xf32> to vector<1x8xf32>
    %41 = vector.shape_cast %40 : vector<1x8xf32> to vector<1x8x1xf32>
    %42 = tpu.reciprocal %41 {approx = true} : vector<1x8x1xf32> -> vector<1x8x1xf32>
    %43 = vector.broadcast %42 : vector<1x8x1xf32> to vector<1x8x8xf32>
    %44 = arith.mulf %39, %43 : vector<1x8x8xf32>
    %45 = arith.truncf %44 : vector<1x8x8xf32> to vector<1x8x8xbf16>
    "tpu.trace_start"() <{level = 10 : i32, message = "bqk,bkd->bqd"}> : () -> ()
    %cst_18 = arith.constant dense<0.000000e+00> : vector<1x8x8xf32>
    %46 = tpu.matmul %45, %33, %cst_18 {dimension_numbers = #tpu.dot_dimension_numbers<[2], [1], [1], [2], [0, 0, 0, 1, 1, 2], [0], [0]>} : vector<1x8x8xbf16>, vector<1x8x8xbf16>, vector<1x8x8xf32> -> vector<1x8x8xf32>
    "tpu.trace_stop"() : () -> ()
    %47 = vector.shape_cast %46 : vector<1x8x8xf32> to vector<8x8xf32>
    %48 = arith.truncf %47 : vector<8x8xf32> to vector<8x8xbf16>
    %c0_19 = arith.constant 0 : index
    %c0_20 = arith.constant 0 : index
    %49 = vector.load %arg14[%c0_19, %c0_20] : memref<8x32xbf16, #tpu.memory_space<vmem>>, vector<8x8xbf16>
    tpu.vector_store %arg14[%c0_19, %c0_20], %48 {strides = array<i32>} : memref<8x32xbf16, #tpu.memory_space<vmem>>, vector<8x8xbf16>,
    %50 = vector.extract_strided_slice %30 {offsets = [0, 0, 8], sizes = [1, 8, 8], strides = [1, 1, 1]} : vector<1x8x96xbf16> to vector<1x8x8xbf16>
    %51 = vector.extract_strided_slice %30 {offsets = [0, 0, 40], sizes = [1, 8, 8], strides = [1, 1, 1]} : vector<1x8x96xbf16> to vector<1x8x8xbf16>
    %52 = vector.extract_strided_slice %30 {offsets = [0, 0, 72], sizes = [1, 8, 8], strides = [1, 1, 1]} : vector<1x8x96xbf16> to vector<1x8x8xbf16>
    "tpu.trace_start"() <{level = 10 : i32, message = "bqd,bkd->bqk"}> : () -> ()
    %cst_21 = arith.constant dense<0.000000e+00> : vector<1x8x8xf32>
    %53 = tpu.matmul %50, %51, %cst_21 {dimension_numbers = #tpu.dot_dimension_numbers<[2], [2], [1], [1], [0, 0, 0, 1, 1, 1], [0], [0]>} : vector<1x8x8xbf16>, vector<1x8x8xbf16>, vector<1x8x8xf32> -> vector<1x8x8xf32>
    "tpu.trace_stop"() : () -> ()
    %cst_22 = arith.constant dense<0xFF800000> : vector<1x8xf32>
    %54 = vector.multi_reduction <maximumf>, %53, %cst_22 [2] : vector<1x8x8xf32> to vector<1x8xf32>
    %55 = vector.shape_cast %54 : vector<1x8xf32> to vector<1x8x1xf32>
    %56 = vector.broadcast %55 : vector<1x8x1xf32> to vector<1x8x8xf32>
    %57 = arith.subf %53, %56 : vector<1x8x8xf32>
    %58 = math.exp %57 : vector<1x8x8xf32>
    %cst_23 = arith.constant dense<0.000000e+00> : vector<1x8xf32>
    %59 = vector.multi_reduction <add>, %58, %cst_23 [2] : vector<1x8x8xf32> to vector<1x8xf32>
    %60 = vector.shape_cast %59 : vector<1x8xf32> to vector<1x8x1xf32>
    %61 = tpu.reciprocal %60 {approx = true} : vector<1x8x1xf32> -> vector<1x8x1xf32>
    %62 = vector.broadcast %61 : vector<1x8x1xf32> to vector<1x8x8xf32>
    %63 = arith.mulf %58, %62 : vector<1x8x8xf32>
    %64 = arith.truncf %63 : vector<1x8x8xf32> to vector<1x8x8xbf16>
    "tpu.trace_start"() <{level = 10 : i32, message = "bqk,bkd->bqd"}> : () -> ()
    %cst_24 = arith.constant dense<0.000000e+00> : vector<1x8x8xf32>
    %65 = tpu.matmul %64, %52, %cst_24 {dimension_numbers = #tpu.dot_dimension_numbers<[2], [1], [1], [2], [0, 0, 0, 1, 1, 2], [0], [0]>} : vector<1x8x8xbf16>, vector<1x8x8xbf16>, vector<1x8x8xf32> -> vector<1x8x8xf32>
    "tpu.trace_stop"() : () -> ()
    %66 = vector.shape_cast %65 : vector<1x8x8xf32> to vector<8x8xf32>
    %67 = arith.truncf %66 : vector<8x8xf32> to vector<8x8xbf16>
    %c0_25 = arith.constant 0 : index
    %c8 = arith.constant 8 : index
    %68 = vector.load %arg14[%c0_25, %c8] : memref<8x32xbf16, #tpu.memory_space<vmem>>, vector<8x8xbf16>
    tpu.vector_store %arg14[%c0_25, %c8], %67 {strides = array<i32>} : memref<8x32xbf16, #tpu.memory_space<vmem>>, vector<8x8xbf16>,
    %69 = vector.extract_strided_slice %30 {offsets = [0, 0, 16], sizes = [1, 8, 8], strides = [1, 1, 1]} : vector<1x8x96xbf16> to vector<1x8x8xbf16>
    %70 = vector.extract_strided_slice %30 {offsets = [0, 0, 48], sizes = [1, 8, 8], strides = [1, 1, 1]} : vector<1x8x96xbf16> to vector<1x8x8xbf16>
    %71 = vector.extract_strided_slice %30 {offsets = [0, 0, 80], sizes = [1, 8, 8], strides = [1, 1, 1]} : vector<1x8x96xbf16> to vector<1x8x8xbf16>
    "tpu.trace_start"() <{level = 10 : i32, message = "bqd,bkd->bqk"}> : () -> ()
    %cst_26 = arith.constant dense<0.000000e+00> : vector<1x8x8xf32>
    %72 = tpu.matmul %69, %70, %cst_26 {dimension_numbers = #tpu.dot_dimension_numbers<[2], [2], [1], [1], [0, 0, 0, 1, 1, 1], [0], [0]>} : vector<1x8x8xbf16>, vector<1x8x8xbf16>, vector<1x8x8xf32> -> vector<1x8x8xf32>
    "tpu.trace_stop"() : () -> ()
    %cst_27 = arith.constant dense<0xFF800000> : vector<1x8xf32>
    %73 = vector.multi_reduction <maximumf>, %72, %cst_27 [2] : vector<1x8x8xf32> to vector<1x8xf32>
    %74 = vector.shape_cast %73 : vector<1x8xf32> to vector<1x8x1xf32>
    %75 = vector.broadcast %74 : vector<1x8x1xf32> to vector<1x8x8xf32>
    %76 = arith.subf %72, %75 : vector<1x8x8xf32>
    %77 = math.exp %76 : vector<1x8x8xf32>
    %cst_28 = arith.constant dense<0.000000e+00> : vector<1x8xf32>
    %78 = vector.multi_reduction <add>, %77, %cst_28 [2] : vector<1x8x8xf32> to vector<1x8xf32>
    %79 = vector.shape_cast %78 : vector<1x8xf32> to vector<1x8x1xf32>
    %80 = tpu.reciprocal %79 {approx = true} : vector<1x8x1xf32> -> vector<1x8x1xf32>
    %81 = vector.broadcast %80 : vector<1x8x1xf32> to vector<1x8x8xf32>
    %82 = arith.mulf %77, %81 : vector<1x8x8xf32>
    %83 = arith.truncf %82 : vector<1x8x8xf32> to vector<1x8x8xbf16>
    "tpu.trace_start"() <{level = 10 : i32, message = "bqk,bkd->bqd"}> : () -> ()
    %cst_29 = arith.constant dense<0.000000e+00> : vector<1x8x8xf32>
    %84 = tpu.matmul %83, %71, %cst_29 {dimension_numbers = #tpu.dot_dimension_numbers<[2], [1], [1], [2], [0, 0, 0, 1, 1, 2], [0], [0]>} : vector<1x8x8xbf16>, vector<1x8x8xbf16>, vector<1x8x8xf32> -> vector<1x8x8xf32>
    "tpu.trace_stop"() : () -> ()
    %85 = vector.shape_cast %84 : vector<1x8x8xf32> to vector<8x8xf32>
    %86 = arith.truncf %85 : vector<8x8xf32> to vector<8x8xbf16>
    %c0_30 = arith.constant 0 : index
    %c16 = arith.constant 16 : index
    %87 = vector.load %arg14[%c0_30, %c16] : memref<8x32xbf16, #tpu.memory_space<vmem>>, vector<8x8xbf16>
    tpu.vector_store %arg14[%c0_30, %c16], %86 {strides = array<i32>} : memref<8x32xbf16, #tpu.memory_space<vmem>>, vector<8x8xbf16>,
    %88 = vector.extract_strided_slice %30 {offsets = [0, 0, 24], sizes = [1, 8, 8], strides = [1, 1, 1]} : vector<1x8x96xbf16> to vector<1x8x8xbf16>
    %89 = vector.extract_strided_slice %30 {offsets = [0, 0, 56], sizes = [1, 8, 8], strides = [1, 1, 1]} : vector<1x8x96xbf16> to vector<1x8x8xbf16>
    %90 = vector.extract_strided_slice %30 {offsets = [0, 0, 88], sizes = [1, 8, 8], strides = [1, 1, 1]} : vector<1x8x96xbf16> to vector<1x8x8xbf16>
    "tpu.trace_start"() <{level = 10 : i32, message = "bqd,bkd->bqk"}> : () -> ()
    %cst_31 = arith.constant dense<0.000000e+00> : vector<1x8x8xf32>
    %91 = tpu.matmul %88, %89, %cst_31 {dimension_numbers = #tpu.dot_dimension_numbers<[2], [2], [1], [1], [0, 0, 0, 1, 1, 1], [0], [0]>} : vector<1x8x8xbf16>, vector<1x8x8xbf16>, vector<1x8x8xf32> -> vector<1x8x8xf32>
    "tpu.trace_stop"() : () -> ()
    %cst_32 = arith.constant dense<0xFF800000> : vector<1x8xf32>
    %92 = vector.multi_reduction <maximumf>, %91, %cst_32 [2] : vector<1x8x8xf32> to vector<1x8xf32>
    %93 = vector.shape_cast %92 : vector<1x8xf32> to vector<1x8x1xf32>
    %94 = vector.broadcast %93 : vector<1x8x1xf32> to vector<1x8x8xf32>
    %95 = arith.subf %91, %94 : vector<1x8x8xf32>
    %96 = math.exp %95 : vector<1x8x8xf32>
    %cst_33 = arith.constant dense<0.000000e+00> : vector<1x8xf32>
    %97 = vector.multi_reduction <add>, %96, %cst_33 [2] : vector<1x8x8xf32> to vector<1x8xf32>
    %98 = vector.shape_cast %97 : vector<1x8xf32> to vector<1x8x1xf32>
    %99 = tpu.reciprocal %98 {approx = true} : vector<1x8x1xf32> -> vector<1x8x1xf32>
    %100 = vector.broadcast %99 : vector<1x8x1xf32> to vector<1x8x8xf32>
    %101 = arith.mulf %96, %100 : vector<1x8x8xf32>
    %102 = arith.truncf %101 : vector<1x8x8xf32> to vector<1x8x8xbf16>
    "tpu.trace_start"() <{level = 10 : i32, message = "bqk,bkd->bqd"}> : () -> ()
    %cst_34 = arith.constant dense<0.000000e+00> : vector<1x8x8xf32>
    %103 = tpu.matmul %102, %90, %cst_34 {dimension_numbers = #tpu.dot_dimension_numbers<[2], [1], [1], [2], [0, 0, 0, 1, 1, 2], [0], [0]>} : vector<1x8x8xbf16>, vector<1x8x8xbf16>, vector<1x8x8xf32> -> vector<1x8x8xf32>
    "tpu.trace_stop"() : () -> ()
    %104 = vector.shape_cast %103 : vector<1x8x8xf32> to vector<8x8xf32>
    %105 = arith.truncf %104 : vector<8x8xf32> to vector<8x8xbf16>
    %c0_35 = arith.constant 0 : index
    %c24 = arith.constant 24 : index
    %106 = vector.load %arg14[%c0_35, %c24] : memref<8x32xbf16, #tpu.memory_space<vmem>>, vector<8x8xbf16>
    tpu.vector_store %arg14[%c0_35, %c24], %105 {strides = array<i32>} : memref<8x32xbf16, #tpu.memory_space<vmem>>, vector<8x8xbf16>,
    %c0_36 = arith.constant 0 : index
    %c0_37 = arith.constant 0 : index
    %107 = vector.load %arg14[%c0_36, %c0_37] : memref<8x32xbf16, #tpu.memory_space<vmem>>, vector<8x32xbf16>
    %c0_38 = arith.constant 0 : index
    %c0_39 = arith.constant 0 : index
    %c0_40 = arith.constant 0 : index
    %108 = vector.load %arg5[%c0_38, %c0_39, %c0_40] : memref<2x32x32xbf16, #tpu.memory_space<vmem>>, vector<1x32x32xbf16>
    %109 = vector.shape_cast %108 : vector<1x32x32xbf16> to vector<32x32xbf16>
    %cst_41 = arith.constant dense<0.000000e+00> : vector<8x32xf32>
    %110 = tpu.matmul %107, %109, %cst_41 {dimension_numbers = #tpu.dot_dimension_numbers<[1], [0], [0], [1], [0, 0, 1, 1], [], []>} : vector<8x32xbf16>, vector<32x32xbf16>, vector<8x32xf32> -> vector<8x32xf32>
    %111 = arith.addf %18, %110 : vector<8x32xf32>
    %c0_42 = arith.constant 0 : index
    %c0_43 = arith.constant 0 : index
    %112 = vector.load %arg6[%c0_42, %c0_43] : memref<2x32xf32, #tpu.memory_space<vmem>>, vector<1x32xf32>
    %113 = vector.broadcast %112 : vector<1x32xf32> to vector<8x32xf32>
    %114 = arith.addf %111, %113 : vector<8x32xf32>
    %c1 = arith.constant 1 : index
    %c0_44 = arith.constant 0 : index
    %115 = vector.load %arg2[%c1, %c0_44] : memref<2x32xf32, #tpu.memory_space<vmem>>, vector<1x32xf32>
    %116 = vector.broadcast %115 : vector<1x32xf32> to vector<8x32xf32>
    %117 = arith.mulf %17, %116 : vector<8x32xf32>
    %c1_45 = arith.constant 1 : index
    %c0_46 = arith.constant 0 : index
    %118 = vector.load %arg3[%c1_45, %c0_46] : memref<2x32xf32, #tpu.memory_space<vmem>>, vector<1x32xf32>
    %119 = vector.broadcast %118 : vector<1x32xf32> to vector<8x32xf32>
    %120 = arith.addf %117, %119 : vector<8x32xf32>
    %121 = arith.truncf %120 : vector<8x32xf32> to vector<8x32xbf16>
    %c1_47 = arith.constant 1 : index
    %c0_48 = arith.constant 0 : index
    %c0_49 = arith.constant 0 : index
    %122 = vector.load %arg4[%c1_47, %c0_48, %c0_49] : memref<2x32x96xbf16, #tpu.memory_space<vmem>>, vector<1x32x96xbf16>
    %123 = vector.shape_cast %122 : vector<1x32x96xbf16> to vector<32x96xbf16>
    %cst_50 = arith.constant dense<0.000000e+00> : vector<8x96xf32>
    %124 = tpu.matmul %121, %123, %cst_50 {dimension_numbers = #tpu.dot_dimension_numbers<[1], [0], [0], [1], [0, 0, 1, 1], [], []>} : vector<8x32xbf16>, vector<32x96xbf16>, vector<8x96xf32> -> vector<8x96xf32>
    %125 = arith.truncf %124 : vector<8x96xf32> to vector<8x96xbf16>
    %126 = vector.shape_cast %125 : vector<8x96xbf16> to vector<1x8x96xbf16>
    %127 = vector.extract_strided_slice %126 {offsets = [0, 0, 0], sizes = [1, 8, 8], strides = [1, 1, 1]} : vector<1x8x96xbf16> to vector<1x8x8xbf16>
    %128 = vector.extract_strided_slice %126 {offsets = [0, 0, 32], sizes = [1, 8, 8], strides = [1, 1, 1]} : vector<1x8x96xbf16> to vector<1x8x8xbf16>
    %129 = vector.extract_strided_slice %126 {offsets = [0, 0, 64], sizes = [1, 8, 8], strides = [1, 1, 1]} : vector<1x8x96xbf16> to vector<1x8x8xbf16>
    "tpu.trace_start"() <{level = 10 : i32, message = "bqd,bkd->bqk"}> : () -> ()
    %cst_51 = arith.constant dense<0.000000e+00> : vector<1x8x8xf32>
    %130 = tpu.matmul %127, %128, %cst_51 {dimension_numbers = #tpu.dot_dimension_numbers<[2], [2], [1], [1], [0, 0, 0, 1, 1, 1], [0], [0]>} : vector<1x8x8xbf16>, vector<1x8x8xbf16>, vector<1x8x8xf32> -> vector<1x8x8xf32>
    "tpu.trace_stop"() : () -> ()
    %cst_52 = arith.constant dense<0xFF800000> : vector<1x8xf32>
    %131 = vector.multi_reduction <maximumf>, %130, %cst_52 [2] : vector<1x8x8xf32> to vector<1x8xf32>
    %132 = vector.shape_cast %131 : vector<1x8xf32> to vector<1x8x1xf32>
    %133 = vector.broadcast %132 : vector<1x8x1xf32> to vector<1x8x8xf32>
    %134 = arith.subf %130, %133 : vector<1x8x8xf32>
    %135 = math.exp %134 : vector<1x8x8xf32>
    %cst_53 = arith.constant dense<0.000000e+00> : vector<1x8xf32>
    %136 = vector.multi_reduction <add>, %135, %cst_53 [2] : vector<1x8x8xf32> to vector<1x8xf32>
    %137 = vector.shape_cast %136 : vector<1x8xf32> to vector<1x8x1xf32>
    %138 = tpu.reciprocal %137 {approx = true} : vector<1x8x1xf32> -> vector<1x8x1xf32>
    %139 = vector.broadcast %138 : vector<1x8x1xf32> to vector<1x8x8xf32>
    %140 = arith.mulf %135, %139 : vector<1x8x8xf32>
    %141 = arith.truncf %140 : vector<1x8x8xf32> to vector<1x8x8xbf16>
    "tpu.trace_start"() <{level = 10 : i32, message = "bqk,bkd->bqd"}> : () -> ()
    %cst_54 = arith.constant dense<0.000000e+00> : vector<1x8x8xf32>
    %142 = tpu.matmul %141, %129, %cst_54 {dimension_numbers = #tpu.dot_dimension_numbers<[2], [1], [1], [2], [0, 0, 0, 1, 1, 2], [0], [0]>} : vector<1x8x8xbf16>, vector<1x8x8xbf16>, vector<1x8x8xf32> -> vector<1x8x8xf32>
    "tpu.trace_stop"() : () -> ()
    %143 = vector.shape_cast %142 : vector<1x8x8xf32> to vector<8x8xf32>
    %144 = arith.truncf %143 : vector<8x8xf32> to vector<8x8xbf16>
    %c0_55 = arith.constant 0 : index
    %c0_56 = arith.constant 0 : index
    %145 = vector.load %arg14[%c0_55, %c0_56] : memref<8x32xbf16, #tpu.memory_space<vmem>>, vector<8x8xbf16>
    tpu.vector_store %arg14[%c0_55, %c0_56], %144 {strides = array<i32>} : memref<8x32xbf16, #tpu.memory_space<vmem>>, vector<8x8xbf16>,
    %146 = vector.extract_strided_slice %126 {offsets = [0, 0, 8], sizes = [1, 8, 8], strides = [1, 1, 1]} : vector<1x8x96xbf16> to vector<1x8x8xbf16>
    %147 = vector.extract_strided_slice %126 {offsets = [0, 0, 40], sizes = [1, 8, 8], strides = [1, 1, 1]} : vector<1x8x96xbf16> to vector<1x8x8xbf16>
    %148 = vector.extract_strided_slice %126 {offsets = [0, 0, 72], sizes = [1, 8, 8], strides = [1, 1, 1]} : vector<1x8x96xbf16> to vector<1x8x8xbf16>
    "tpu.trace_start"() <{level = 10 : i32, message = "bqd,bkd->bqk"}> : () -> ()
    %cst_57 = arith.constant dense<0.000000e+00> : vector<1x8x8xf32>
    %149 = tpu.matmul %146, %147, %cst_57 {dimension_numbers = #tpu.dot_dimension_numbers<[2], [2], [1], [1], [0, 0, 0, 1, 1, 1], [0], [0]>} : vector<1x8x8xbf16>, vector<1x8x8xbf16>, vector<1x8x8xf32> -> vector<1x8x8xf32>
    "tpu.trace_stop"() : () -> ()
    %cst_58 = arith.constant dense<0xFF800000> : vector<1x8xf32>
    %150 = vector.multi_reduction <maximumf>, %149, %cst_58 [2] : vector<1x8x8xf32> to vector<1x8xf32>
    %151 = vector.shape_cast %150 : vector<1x8xf32> to vector<1x8x1xf32>
    %152 = vector.broadcast %151 : vector<1x8x1xf32> to vector<1x8x8xf32>
    %153 = arith.subf %149, %152 : vector<1x8x8xf32>
    %154 = math.exp %153 : vector<1x8x8xf32>
    %cst_59 = arith.constant dense<0.000000e+00> : vector<1x8xf32>
    %155 = vector.multi_reduction <add>, %154, %cst_59 [2] : vector<1x8x8xf32> to vector<1x8xf32>
    %156 = vector.shape_cast %155 : vector<1x8xf32> to vector<1x8x1xf32>
    %157 = tpu.reciprocal %156 {approx = true} : vector<1x8x1xf32> -> vector<1x8x1xf32>
    %158 = vector.broadcast %157 : vector<1x8x1xf32> to vector<1x8x8xf32>
    %159 = arith.mulf %154, %158 : vector<1x8x8xf32>
    %160 = arith.truncf %159 : vector<1x8x8xf32> to vector<1x8x8xbf16>
    "tpu.trace_start"() <{level = 10 : i32, message = "bqk,bkd->bqd"}> : () -> ()
    %cst_60 = arith.constant dense<0.000000e+00> : vector<1x8x8xf32>
    %161 = tpu.matmul %160, %148, %cst_60 {dimension_numbers = #tpu.dot_dimension_numbers<[2], [1], [1], [2], [0, 0, 0, 1, 1, 2], [0], [0]>} : vector<1x8x8xbf16>, vector<1x8x8xbf16>, vector<1x8x8xf32> -> vector<1x8x8xf32>
    "tpu.trace_stop"() : () -> ()
    %162 = vector.shape_cast %161 : vector<1x8x8xf32> to vector<8x8xf32>
    %163 = arith.truncf %162 : vector<8x8xf32> to vector<8x8xbf16>
    %c0_61 = arith.constant 0 : index
    %c8_62 = arith.constant 8 : index
    %164 = vector.load %arg14[%c0_61, %c8_62] : memref<8x32xbf16, #tpu.memory_space<vmem>>, vector<8x8xbf16>
    tpu.vector_store %arg14[%c0_61, %c8_62], %163 {strides = array<i32>} : memref<8x32xbf16, #tpu.memory_space<vmem>>, vector<8x8xbf16>,
    %165 = vector.extract_strided_slice %126 {offsets = [0, 0, 16], sizes = [1, 8, 8], strides = [1, 1, 1]} : vector<1x8x96xbf16> to vector<1x8x8xbf16>
    %166 = vector.extract_strided_slice %126 {offsets = [0, 0, 48], sizes = [1, 8, 8], strides = [1, 1, 1]} : vector<1x8x96xbf16> to vector<1x8x8xbf16>
    %167 = vector.extract_strided_slice %126 {offsets = [0, 0, 80], sizes = [1, 8, 8], strides = [1, 1, 1]} : vector<1x8x96xbf16> to vector<1x8x8xbf16>
    "tpu.trace_start"() <{level = 10 : i32, message = "bqd,bkd->bqk"}> : () -> ()
    %cst_63 = arith.constant dense<0.000000e+00> : vector<1x8x8xf32>
    %168 = tpu.matmul %165, %166, %cst_63 {dimension_numbers = #tpu.dot_dimension_numbers<[2], [2], [1], [1], [0, 0, 0, 1, 1, 1], [0], [0]>} : vector<1x8x8xbf16>, vector<1x8x8xbf16>, vector<1x8x8xf32> -> vector<1x8x8xf32>
    "tpu.trace_stop"() : () -> ()
    %cst_64 = arith.constant dense<0xFF800000> : vector<1x8xf32>
    %169 = vector.multi_reduction <maximumf>, %168, %cst_64 [2] : vector<1x8x8xf32> to vector<1x8xf32>
    %170 = vector.shape_cast %169 : vector<1x8xf32> to vector<1x8x1xf32>
    %171 = vector.broadcast %170 : vector<1x8x1xf32> to vector<1x8x8xf32>
    %172 = arith.subf %168, %171 : vector<1x8x8xf32>
    %173 = math.exp %172 : vector<1x8x8xf32>
    %cst_65 = arith.constant dense<0.000000e+00> : vector<1x8xf32>
    %174 = vector.multi_reduction <add>, %173, %cst_65 [2] : vector<1x8x8xf32> to vector<1x8xf32>
    %175 = vector.shape_cast %174 : vector<1x8xf32> to vector<1x8x1xf32>
    %176 = tpu.reciprocal %175 {approx = true} : vector<1x8x1xf32> -> vector<1x8x1xf32>
    %177 = vector.broadcast %176 : vector<1x8x1xf32> to vector<1x8x8xf32>
    %178 = arith.mulf %173, %177 : vector<1x8x8xf32>
    %179 = arith.truncf %178 : vector<1x8x8xf32> to vector<1x8x8xbf16>
    "tpu.trace_start"() <{level = 10 : i32, message = "bqk,bkd->bqd"}> : () -> ()
    %cst_66 = arith.constant dense<0.000000e+00> : vector<1x8x8xf32>
    %180 = tpu.matmul %179, %167, %cst_66 {dimension_numbers = #tpu.dot_dimension_numbers<[2], [1], [1], [2], [0, 0, 0, 1, 1, 2], [0], [0]>} : vector<1x8x8xbf16>, vector<1x8x8xbf16>, vector<1x8x8xf32> -> vector<1x8x8xf32>
    "tpu.trace_stop"() : () -> ()
    %181 = vector.shape_cast %180 : vector<1x8x8xf32> to vector<8x8xf32>
    %182 = arith.truncf %181 : vector<8x8xf32> to vector<8x8xbf16>
    %c0_67 = arith.constant 0 : index
    %c16_68 = arith.constant 16 : index
    %183 = vector.load %arg14[%c0_67, %c16_68] : memref<8x32xbf16, #tpu.memory_space<vmem>>, vector<8x8xbf16>
    tpu.vector_store %arg14[%c0_67, %c16_68], %182 {strides = array<i32>} : memref<8x32xbf16, #tpu.memory_space<vmem>>, vector<8x8xbf16>,
    %184 = vector.extract_strided_slice %126 {offsets = [0, 0, 24], sizes = [1, 8, 8], strides = [1, 1, 1]} : vector<1x8x96xbf16> to vector<1x8x8xbf16>
    %185 = vector.extract_strided_slice %126 {offsets = [0, 0, 56], sizes = [1, 8, 8], strides = [1, 1, 1]} : vector<1x8x96xbf16> to vector<1x8x8xbf16>
    %186 = vector.extract_strided_slice %126 {offsets = [0, 0, 88], sizes = [1, 8, 8], strides = [1, 1, 1]} : vector<1x8x96xbf16> to vector<1x8x8xbf16>
    "tpu.trace_start"() <{level = 10 : i32, message = "bqd,bkd->bqk"}> : () -> ()
    %cst_69 = arith.constant dense<0.000000e+00> : vector<1x8x8xf32>
    %187 = tpu.matmul %184, %185, %cst_69 {dimension_numbers = #tpu.dot_dimension_numbers<[2], [2], [1], [1], [0, 0, 0, 1, 1, 1], [0], [0]>} : vector<1x8x8xbf16>, vector<1x8x8xbf16>, vector<1x8x8xf32> -> vector<1x8x8xf32>
    "tpu.trace_stop"() : () -> ()
    %cst_70 = arith.constant dense<0xFF800000> : vector<1x8xf32>
    %188 = vector.multi_reduction <maximumf>, %187, %cst_70 [2] : vector<1x8x8xf32> to vector<1x8xf32>
    %189 = vector.shape_cast %188 : vector<1x8xf32> to vector<1x8x1xf32>
    %190 = vector.broadcast %189 : vector<1x8x1xf32> to vector<1x8x8xf32>
    %191 = arith.subf %187, %190 : vector<1x8x8xf32>
    %192 = math.exp %191 : vector<1x8x8xf32>
    %cst_71 = arith.constant dense<0.000000e+00> : vector<1x8xf32>
    %193 = vector.multi_reduction <add>, %192, %cst_71 [2] : vector<1x8x8xf32> to vector<1x8xf32>
    %194 = vector.shape_cast %193 : vector<1x8xf32> to vector<1x8x1xf32>
    %195 = tpu.reciprocal %194 {approx = true} : vector<1x8x1xf32> -> vector<1x8x1xf32>
    %196 = vector.broadcast %195 : vector<1x8x1xf32> to vector<1x8x8xf32>
    %197 = arith.mulf %192, %196 : vector<1x8x8xf32>
    %198 = arith.truncf %197 : vector<1x8x8xf32> to vector<1x8x8xbf16>
    "tpu.trace_start"() <{level = 10 : i32, message = "bqk,bkd->bqd"}> : () -> ()
    %cst_72 = arith.constant dense<0.000000e+00> : vector<1x8x8xf32>
    %199 = tpu.matmul %198, %186, %cst_72 {dimension_numbers = #tpu.dot_dimension_numbers<[2], [1], [1], [2], [0, 0, 0, 1, 1, 2], [0], [0]>} : vector<1x8x8xbf16>, vector<1x8x8xbf16>, vector<1x8x8xf32> -> vector<1x8x8xf32>
    "tpu.trace_stop"() : () -> ()
    %200 = vector.shape_cast %199 : vector<1x8x8xf32> to vector<8x8xf32>
    %201 = arith.truncf %200 : vector<8x8xf32> to vector<8x8xbf16>
    %c0_73 = arith.constant 0 : index
    %c24_74 = arith.constant 24 : index
    %202 = vector.load %arg14[%c0_73, %c24_74] : memref<8x32xbf16, #tpu.memory_space<vmem>>, vector<8x8xbf16>
    tpu.vector_store %arg14[%c0_73, %c24_74], %201 {strides = array<i32>} : memref<8x32xbf16, #tpu.memory_space<vmem>>, vector<8x8xbf16>,
    %c0_75 = arith.constant 0 : index
    %c0_76 = arith.constant 0 : index
    %203 = vector.load %arg14[%c0_75, %c0_76] : memref<8x32xbf16, #tpu.memory_space<vmem>>, vector<8x32xbf16>
    %c1_77 = arith.constant 1 : index
    %c0_78 = arith.constant 0 : index
    %c0_79 = arith.constant 0 : index
    %204 = vector.load %arg5[%c1_77, %c0_78, %c0_79] : memref<2x32x32xbf16, #tpu.memory_space<vmem>>, vector<1x32x32xbf16>
    %205 = vector.shape_cast %204 : vector<1x32x32xbf16> to vector<32x32xbf16>
    %cst_80 = arith.constant dense<0.000000e+00> : vector<8x32xf32>
    %206 = tpu.matmul %203, %205, %cst_80 {dimension_numbers = #tpu.dot_dimension_numbers<[1], [0], [0], [1], [0, 0, 1, 1], [], []>} : vector<8x32xbf16>, vector<32x32xbf16>, vector<8x32xf32> -> vector<8x32xf32>
    %207 = arith.addf %114, %206 : vector<8x32xf32>
    %c1_81 = arith.constant 1 : index
    %c0_82 = arith.constant 0 : index
    %208 = vector.load %arg6[%c1_81, %c0_82] : memref<2x32xf32, #tpu.memory_space<vmem>>, vector<1x32xf32>
    %209 = vector.broadcast %208 : vector<1x32xf32> to vector<8x32xf32>
    %210 = arith.addf %207, %209 : vector<8x32xf32>
    %211 = arith.addf %1, %210 : vector<8x32xf32>
    %cst_83 = arith.constant dense<0.000000e+00> : vector<8xf32>
    %212 = vector.multi_reduction <add>, %211, %cst_83 [1] : vector<8x32xf32> to vector<8xf32>
    %213 = vector.shape_cast %212 : vector<8xf32> to vector<8x1xf32>
    %cst_84 = arith.constant 3.200000e+01 : f32
    %214 = vector.broadcast %cst_84 : f32 to vector<8x1xf32>
    %215 = arith.divf %213, %214 : vector<8x1xf32>
    %216 = vector.broadcast %215 : vector<8x1xf32> to vector<8x32xf32>
    %217 = arith.subf %211, %216 : vector<8x32xf32>
    %218 = arith.mulf %217, %217 : vector<8x32xf32>
    %cst_85 = arith.constant dense<0.000000e+00> : vector<8xf32>
    %219 = vector.multi_reduction <add>, %218, %cst_85 [1] : vector<8x32xf32> to vector<8xf32>
    %220 = vector.shape_cast %219 : vector<8xf32> to vector<8x1xf32>
    %cst_86 = arith.constant 3.200000e+01 : f32
    %221 = vector.broadcast %cst_86 : f32 to vector<8x1xf32>
    %222 = arith.divf %220, %221 : vector<8x1xf32>
    %cst_87 = arith.constant 9.99999974E-6 : f32
    %223 = vector.broadcast %cst_87 : f32 to vector<8x1xf32>
    %224 = arith.addf %222, %223 : vector<8x1xf32>
    %225 = math.rsqrt %224 : vector<8x1xf32>
    %226 = vector.broadcast %225 : vector<8x1xf32> to vector<8x32xf32>
    %227 = arith.mulf %217, %226 : vector<8x32xf32>
    %cst_88 = arith.constant 0.000000e+00 : f32
    %228 = vector.broadcast %cst_88 : f32 to vector<8x32xf32>
    %c0_89 = arith.constant 0 : index
    %c0_90 = arith.constant 0 : index
    %229 = vector.load %arg7[%c0_89, %c0_90] : memref<2x32xf32, #tpu.memory_space<vmem>>, vector<1x32xf32>
    %230 = vector.broadcast %229 : vector<1x32xf32> to vector<8x32xf32>
    %231 = arith.mulf %227, %230 : vector<8x32xf32>
    %c0_91 = arith.constant 0 : index
    %c0_92 = arith.constant 0 : index
    %232 = vector.load %arg8[%c0_91, %c0_92] : memref<2x32xf32, #tpu.memory_space<vmem>>, vector<1x32xf32>
    %233 = vector.broadcast %232 : vector<1x32xf32> to vector<8x32xf32>
    %234 = arith.addf %231, %233 : vector<8x32xf32>
    %235 = arith.truncf %234 : vector<8x32xf32> to vector<8x32xbf16>
    %c0_93 = arith.constant 0 : index
    %c0_94 = arith.constant 0 : index
    %c0_95 = arith.constant 0 : index
    %236 = vector.load %arg9[%c0_93, %c0_94, %c0_95] : memref<2x32x128xbf16, #tpu.memory_space<vmem>>, vector<1x32x128xbf16>
    %237 = vector.shape_cast %236 : vector<1x32x128xbf16> to vector<32x128xbf16>
    %cst_96 = arith.constant dense<0.000000e+00> : vector<8x128xf32>
    %238 = tpu.matmul %235, %237, %cst_96 {dimension_numbers = #tpu.dot_dimension_numbers<[1], [0], [0], [1], [0, 0, 1, 1], [], []>} : vector<8x32xbf16>, vector<32x128xbf16>, vector<8x128xf32> -> vector<8x128xf32>
    %c0_97 = arith.constant 0 : index
    %c0_98 = arith.constant 0 : index
    %239 = vector.load %arg10[%c0_97, %c0_98] : memref<2x128xf32, #tpu.memory_space<vmem>>, vector<1x128xf32>
    %240 = vector.broadcast %239 : vector<1x128xf32> to vector<8x128xf32>
    %241 = arith.addf %238, %240 : vector<8x128xf32>
    %cst_99 = arith.constant 5.000000e-01 : f32
    %242 = vector.broadcast %cst_99 : f32 to vector<8x128xf32>
    %243 = arith.mulf %242, %241 : vector<8x128xf32>
    %cst_100 = arith.constant 0.707106769 : f32
    %244 = vector.broadcast %cst_100 : f32 to vector<8x128xf32>
    %245 = arith.mulf %241, %244 : vector<8x128xf32>
    %246 = math.erf %245 : vector<8x128xf32>
    %cst_101 = arith.constant 1.000000e+00 : f32
    %247 = vector.broadcast %cst_101 : f32 to vector<8x128xf32>
    %248 = arith.addf %247, %246 : vector<8x128xf32>
    %249 = arith.mulf %243, %248 : vector<8x128xf32>
    %250 = arith.truncf %249 : vector<8x128xf32> to vector<8x128xbf16>
    %c0_102 = arith.constant 0 : index
    %c0_103 = arith.constant 0 : index
    %c0_104 = arith.constant 0 : index
    %251 = vector.load %arg11[%c0_102, %c0_103, %c0_104] : memref<2x128x32xbf16, #tpu.memory_space<vmem>>, vector<1x128x32xbf16>
    %252 = vector.shape_cast %251 : vector<1x128x32xbf16> to vector<128x32xbf16>
    %cst_105 = arith.constant dense<0.000000e+00> : vector<8x32xf32>
    %253 = tpu.matmul %250, %252, %cst_105 {dimension_numbers = #tpu.dot_dimension_numbers<[1], [0], [0], [1], [0, 0, 1, 1], [], []>} : vector<8x128xbf16>, vector<128x32xbf16>, vector<8x32xf32> -> vector<8x32xf32>
    %254 = arith.addf %228, %253 : vector<8x32xf32>
    %c0_106 = arith.constant 0 : index
    %c0_107 = arith.constant 0 : index
    %255 = vector.load %arg12[%c0_106, %c0_107] : memref<2x32xf32, #tpu.memory_space<vmem>>, vector<1x32xf32>
    %256 = vector.broadcast %255 : vector<1x32xf32> to vector<8x32xf32>
    %257 = arith.addf %254, %256 : vector<8x32xf32>
    %c1_108 = arith.constant 1 : index
    %c0_109 = arith.constant 0 : index
    %258 = vector.load %arg7[%c1_108, %c0_109] : memref<2x32xf32, #tpu.memory_space<vmem>>, vector<1x32xf32>
    %259 = vector.broadcast %258 : vector<1x32xf32> to vector<8x32xf32>
    %260 = arith.mulf %227, %259 : vector<8x32xf32>
    %c1_110 = arith.constant 1 : index
    %c0_111 = arith.constant 0 : index
    %261 = vector.load %arg8[%c1_110, %c0_111] : memref<2x32xf32, #tpu.memory_space<vmem>>, vector<1x32xf32>
    %262 = vector.broadcast %261 : vector<1x32xf32> to vector<8x32xf32>
    %263 = arith.addf %260, %262 : vector<8x32xf32>
    %264 = arith.truncf %263 : vector<8x32xf32> to vector<8x32xbf16>
    %c1_112 = arith.constant 1 : index
    %c0_113 = arith.constant 0 : index
    %c0_114 = arith.constant 0 : index
    %265 = vector.load %arg9[%c1_112, %c0_113, %c0_114] : memref<2x32x128xbf16, #tpu.memory_space<vmem>>, vector<1x32x128xbf16>
    %266 = vector.shape_cast %265 : vector<1x32x128xbf16> to vector<32x128xbf16>
    %cst_115 = arith.constant dense<0.000000e+00> : vector<8x128xf32>
    %267 = tpu.matmul %264, %266, %cst_115 {dimension_numbers = #tpu.dot_dimension_numbers<[1], [0], [0], [1], [0, 0, 1, 1], [], []>} : vector<8x32xbf16>, vector<32x128xbf16>, vector<8x128xf32> -> vector<8x128xf32>
    %c1_116 = arith.constant 1 : index
    %c0_117 = arith.constant 0 : index
    %268 = vector.load %arg10[%c1_116, %c0_117] : memref<2x128xf32, #tpu.memory_space<vmem>>, vector<1x128xf32>
    %269 = vector.broadcast %268 : vector<1x128xf32> to vector<8x128xf32>
    %270 = arith.addf %267, %269 : vector<8x128xf32>
    %cst_118 = arith.constant 5.000000e-01 : f32
    %271 = vector.broadcast %cst_118 : f32 to vector<8x128xf32>
    %272 = arith.mulf %271, %270 : vector<8x128xf32>
    %cst_119 = arith.constant 0.707106769 : f32
    %273 = vector.broadcast %cst_119 : f32 to vector<8x128xf32>
    %274 = arith.mulf %270, %273 : vector<8x128xf32>
    %275 = math.erf %274 : vector<8x128xf32>
    %cst_120 = arith.constant 1.000000e+00 : f32
    %276 = vector.broadcast %cst_120 : f32 to vector<8x128xf32>
    %277 = arith.addf %276, %275 : vector<8x128xf32>
    %278 = arith.mulf %272, %277 : vector<8x128xf32>
    %279 = arith.truncf %278 : vector<8x128xf32> to vector<8x128xbf16>
    %c1_121 = arith.constant 1 : index
    %c0_122 = arith.constant 0 : index
    %c0_123 = arith.constant 0 : index
    %280 = vector.load %arg11[%c1_121, %c0_122, %c0_123] : memref<2x128x32xbf16, #tpu.memory_space<vmem>>, vector<1x128x32xbf16>
    %281 = vector.shape_cast %280 : vector<1x128x32xbf16> to vector<128x32xbf16>
    %cst_124 = arith.constant dense<0.000000e+00> : vector<8x32xf32>
    %282 = tpu.matmul %279, %281, %cst_124 {dimension_numbers = #tpu.dot_dimension_numbers<[1], [0], [0], [1], [0, 0, 1, 1], [], []>} : vector<8x128xbf16>, vector<128x32xbf16>, vector<8x32xf32> -> vector<8x32xf32>
    %283 = arith.addf %257, %282 : vector<8x32xf32>
    %c1_125 = arith.constant 1 : index
    %c0_126 = arith.constant 0 : index
    %284 = vector.load %arg12[%c1_125, %c0_126] : memref<2x32xf32, #tpu.memory_space<vmem>>, vector<1x32xf32>
    %285 = vector.broadcast %284 : vector<1x32xf32> to vector<8x32xf32>
    %286 = arith.addf %283, %285 : vector<8x32xf32>
    %287 = arith.addf %211, %286 : vector<8x32xf32>
    %288 = vector.shape_cast %287 : vector<8x32xf32> to vector<1x8x32xf32>
    %c0_127 = arith.constant 0 : index
    %c0_128 = arith.constant 0 : index
    %c0_129 = arith.constant 0 : index
    %289 = vector.load %arg13[%c0_127, %c0_128, %c0_129] : memref<1x8x32xf32, #tpu.memory_space<vmem>>, vector<1x8x32xf32>
    tpu.vector_store %arg13[%c0_127, %c0_128, %c0_129], %288 {strides = array<i32>} : memref<1x8x32xf32, #tpu.memory_space<vmem>>, vector<1x8x32xf32>,
    return
  }
  func.func @transform_0(%arg0: i32) -> (i32, i32, i32) {
    %c0_i32 = arith.constant 0 : i32
    %c0_i32_0 = arith.constant 0 : i32
    %c0_i32_1 = arith.constant 0 : i32
    return %arg0, %c0_i32, %c0_i32_0 : i32, i32, i32
  }
  func.func @transform_1(%arg0: i32) -> (i32, i32) {
    %c0_i32 = arith.constant 0 : i32
    %c0_i32_0 = arith.constant 0 : i32
    %c0_i32_1 = arith.constant 0 : i32
    return %c0_i32, %c0_i32_0 : i32, i32
  }
  func.func @transform_2(%arg0: i32) -> (i32, i32) {
    %c0_i32 = arith.constant 0 : i32
    %c0_i32_0 = arith.constant 0 : i32
    %c0_i32_1 = arith.constant 0 : i32
    return %c0_i32, %c0_i32_0 : i32, i32
  }
  func.func @transform_3(%arg0: i32) -> (i32, i32, i32) {
    %c0_i32 = arith.constant 0 : i32
    %c0_i32_0 = arith.constant 0 : i32
    %c0_i32_1 = arith.constant 0 : i32
    %c0_i32_2 = arith.constant 0 : i32
    return %c0_i32, %c0_i32_0, %c0_i32_1 : i32, i32, i32
  }
  func.func @transform_4(%arg0: i32) -> (i32, i32, i32) {
    %c0_i32 = arith.constant 0 : i32
    %c0_i32_0 = arith.constant 0 : i32
    %c0_i32_1 = arith.constant 0 : i32
    %c0_i32_2 = arith.constant 0 : i32
    return %c0_i32, %c0_i32_0, %c0_i32_1 : i32, i32, i32
  }
  func.func @transform_5(%arg0: i32) -> (i32, i32) {
    %c0_i32 = arith.constant 0 : i32
    %c0_i32_0 = arith.constant 0 : i32
    %c0_i32_1 = arith.constant 0 : i32
    return %c0_i32, %c0_i32_0 : i32, i32
  }
  func.func @transform_6(%arg0: i32) -> (i32, i32) {
    %c0_i32 = arith.constant 0 : i32
    %c0_i32_0 = arith.constant 0 : i32
    %c0_i32_1 = arith.constant 0 : i32
    return %c0_i32, %c0_i32_0 : i32, i32
  }
  func.func @transform_7(%arg0: i32) -> (i32, i32) {
    %c0_i32 = arith.constant 0 : i32
    %c0_i32_0 = arith.constant 0 : i32
    %c0_i32_1 = arith.constant 0 : i32
    return %c0_i32, %c0_i32_0 : i32, i32
  }
  func.func @transform_8(%arg0: i32) -> (i32, i32, i32) {
    %c0_i32 = arith.constant 0 : i32
    %c0_i32_0 = arith.constant 0 : i32
    %c0_i32_1 = arith.constant 0 : i32
    %c0_i32_2 = arith.constant 0 : i32
    return %c0_i32, %c0_i32_0, %c0_i32_1 : i32, i32, i32
  }
  func.func @transform_9(%arg0: i32) -> (i32, i32) {
    %c0_i32 = arith.constant 0 : i32
    %c0_i32_0 = arith.constant 0 : i32
    %c0_i32_1 = arith.constant 0 : i32
    return %c0_i32, %c0_i32_0 : i32, i32
  }
  func.func @transform_10(%arg0: i32) -> (i32, i32, i32) {
    %c0_i32 = arith.constant 0 : i32
    %c0_i32_0 = arith.constant 0 : i32
    %c0_i32_1 = arith.constant 0 : i32
    %c0_i32_2 = arith.constant 0 : i32
    return %c0_i32, %c0_i32_0, %c0_i32_1 : i32, i32, i32
  }
  func.func @transform_11(%arg0: i32) -> (i32, i32) {
    %c0_i32 = arith.constant 0 : i32
    %c0_i32_0 = arith.constant 0 : i32
    %c0_i32_1 = arith.constant 0 : i32
    return %c0_i32, %c0_i32_0 : i32, i32
  }
  func.func @transform_12(%arg0: i32) -> (i32, i32, i32) {
    %c0_i32 = arith.constant 0 : i32
    %c0_i32_0 = arith.constant 0 : i32
    %c0_i32_1 = arith.constant 0 : i32
    return %arg0, %c0_i32, %c0_i32_0 : i32, i32, i32
  }
}

</mosaic_0001>

<bundles_post_ra>
// kernel: tpu_custom_call.1
= control target key start
LH: loop header
LB: loop body
LE: loop exit
PB: predicated region body
PF: predicated region fallthrough
CT: control target
= control target key end

     0   :  { %6 = vsyncpa [#allocation3], 0  ;;  %s340_s0 = inlined_call_operand.hbm [shape: f32[8,128], index: 0, kind: input, shape index: {}]   ;;  %s341_s1 = inlined_call_operand.hbm [shape: f32[8,128], index: 1, kind: output, shape index: {}]  }
   0x1   :  { %7 = vsyncpa [#allocation4], 0  ;;  %s261_s6 = smov 0  }
   0x2 LB: > { %s144_s7 = sadd.s32 4294967295, %s247_s6   ;;  %p145_p0 = scmp.ge.s32.totalorder %s247_s6, 1  ;;  %s247_s6 = sphi %s261_s6, %s13_s6  }
   0x3   : > { %p60_p1 = scmp.lt.s32.totalorder %s247_s6, 3  ;;  %p275_p3 = scmp.eq.s32.totalorder %s144_s7, 0 }
   0x4   : > { %s249_s10 = smov [#allocation2]   ;;  %s179_s15 = scalar_lea.hbm %s340_s0, 128 }
   0x5   : > { %p269_p2 = pnand %p145_p0, %p60_p1  ;;  %s73_s11 = sshll.u32 %s249_s10, 4  ;;  %s74_s11 = int_to_ptr.vmem [resolvable:$true] %s73_s11 }
   0x6   : > { %s346_s9 = scalar_select %p275_p3, 1, 0 }
   0x7   : > { %s345_s8 = scalar_select %p269_p2, 1, 0 }
   0x8   : > { %p161_p4 = pneg %p269_p2  ;;  %p180_p6 = scmp.ne.s32.totalorder %s340_s0, %s179_s15 }
   0x9   : > { %p186_p10 = scmp.lt.u32.totalorder %s179_s15, %s340_s0 }
   0xa   : > { %p283_p5 = pnand %p275_p3, %p161_p4 }
   0xc   : > { %p181_p7 = pneg %p283_p5 }
   0xe   : > { %p182_p8 = pnand %p181_p7, %p180_p6 }
  0x10   : > { %p183_p9 = pneg %p182_p8 }
  0x12   : > { %p188_p11 = pnand %p186_p10, %p183_p9 }
  0x14   : > { %191 = shalt.err (!%p188_p11)
}
  0x15   : > { %s192_s20 = scalar_lea.vmem %s74_s11, 128  ;;  %p200_p1 = scmp.lt.s32.totalorder %s74_s11, %s74_s11 }
  0x16   : > { %p193_p12 = scmp.ne.s32.totalorder %s74_s11, %s192_s20  ;;  %p201_p4 = scmp.lt.s32.totalorder %s192_s20, %s192_s20 }
  0x18   : > { %p195_p13 = pnand %p193_p12, %p181_p7  ;;  %p202_p3 = por %p201_p4, %p200_p1 }
  0x1a   : > { %p196_p0 = pneg %p195_p13 }
  0x1c   : > { %p203_p2 = pnand %p202_p3, %p196_p0 }
  0x1e   : > { %206 = shalt.err (!%p203_p2)
}
  0x1f   : > { %164 = dma.hbm_to_vmem [thread:$0]  (!%p283_p5), %s340_s0, 128, %s74_s11, [#allocation3]  }
  0x20   : > { %p348_p6 = scmp.ne.s32.totalorder %s345_s8, 0 }
  0x21   : > { %p349_p8 = scmp.ne.s32.totalorder (!%p348_p6), %s346_s9, 0 }
  0x22   : > { %86 = sbr.rel (%p348_p6) target bundleno = 67 (0x43), region = 24 }
  0x29   : > { %238 = dma.done.wait (%p349_p8), [#allocation3], 128  }
  0x2a   : > { %240 = vsyncadd (%p349_p8), [#allocation3], 4294967168  ;;  %s250_s23 = smov [#allocation5]   ;;  %p311_p2 = scmp.eq.s32.totalorder %s144_s7, 1  ;;  %v96_v0 = vld [vmem:[#allocation2] sm:$0xff] }
  0x2b   : > { %s105_s24 = sshll.u32 %s250_s23, 4  ;;  %97 = vst [vmem:[#allocation5] sm:$0xff] %v96_v0  ;;  %s106_s24 = int_to_ptr.vmem [resolvable:$true] %s105_s24 }
  0x2c   : > { %s207_s26 = scalar_lea.vmem %s106_s24, 128  ;;  %p214_p9 = scmp.lt.s32.totalorder %s106_s24, %s106_s24 }
  0x2d   : > { %p208_p3 = scmp.ne.s32.totalorder %s106_s24, %s207_s26  ;;  %p215_p10 = scmp.lt.s32.totalorder %s207_s26, %s207_s26 }
  0x2f   : > { %p209_p5 = pnand %p208_p3, %p311_p2  ;;  %p216_p11 = por %p215_p10, %p214_p9 }
  0x31   : > { %p210_p7 = pneg %p209_p5 }
  0x33   : > { %p217_p12 = pnand %p216_p11, %p210_p7 }
  0x35   : > { %220 = shalt.err (!%p217_p12)
}
  0x36   : > { %s221_s29 = scalar_lea.hbm %s341_s1, 128 }
  0x37   : > { %p222_p13 = scmp.ne.s32.totalorder %s341_s1, %s221_s29  ;;  %p227_p4 = scmp.lt.u32.totalorder %s221_s29, %s341_s1 }
  0x39   : > { %p223_p0 = pnand %p222_p13, %p311_p2 }
  0x3b   : > { %p224_p1 = pneg %p223_p0 }
  0x3d   : > { %p229_p6 = pnand %p227_p4, %p224_p1 }
  0x3f   : > { %232 = shalt.err (!%p229_p6)
}
  0x40   : > { %158 = dma.vmem_to_hbm [thread:$0]  (%p311_p2), %s106_s24, 128, %s341_s1, [#allocation4]  }
  0x41   : > { %242 = dma.done.wait (%p311_p2), [#allocation4], 128  }
  0x42   : > { %244 = vsyncadd (%p311_p2), [#allocation4], 4294967168 }
  0x43 PF: > { %s13_s6 = sadd.s32 1, %s247_s6  }
  0x44   : > { %p10_p8 = scmp.ge.s32.totalorder %s13_s6, 4  }
  0x46   :  { %12 = sbr.rel (!%p10_p8) target bundleno = 2 (0x2), region = 53 }
  0x4d   :  { %118 = vsyncpa [#allocation3], 1 }
  0x4e   :  { %120 = vsyncpa [#allocation3 + $0x1], 1 }
  0x4f   :  { %121 = vsyncpa [#allocation4], 1 }
  0x50   :  { %123 = vsyncpa [#allocation4 + $0x1], 1 }

// kernel: tpu_custom_call.1
= control target key start
LH: loop header
LB: loop body
LE: loop exit
PB: predicated region body
PF: predicated region fallthrough
CT: control target
= control target key end

     0   :  { %s3212_s0 = inlined_call_operand.vmem [shape: f32[2,8,32], index: 0, kind: input, shape index: {}]   ;;  %s3213_s1 = inlined_call_operand.vmem [shape: f32[2,32], index: 1, kind: input, shape index: {}]   ;;  %s3214_s2 = inlined_call_operand.vmem [shape: f32[2,32], index: 2, kind: input, shape index: {}]   ;;  %s3215_s3 = inlined_call_operand.vmem [shape: bf16[2,32,96], index: 3, kind: input, shape index: {}]   ;;  %s3216_s4 = inlined_call_operand.vmem [shape: bf16[2,32,32], index: 4, kind: input, shape index: {}]   ;;  %s3217_s5 = inlined_call_operand.vmem [shape: f32[2,32], index: 5, kind: input, shape index: {}]   ;;  %s3218_s6 = inlined_call_operand.vmem [shape: f32[2,32], index: 6, kind: input, shape index: {}]   ;;  %s3219_s7 = inlined_call_operand.vmem [shape: f32[2,32], index: 7, kind: input, shape index: {}]   ;;  %s3220_s8 = inlined_call_operand.vmem [shape: bf16[2,32,128], index: 8, kind: input, shape index: {}]   ;;  %s3221_s9 = inlined_call_operand.vmem [shape: f32[2,128], index: 9, kind: input, shape index: {}]   ;;  %s3222_s10 = inlined_call_operand.vmem [shape: bf16[2,128,32], index: 10, kind: input, shape index: {}]   ;;  %s3223_s11 = inlined_call_operand.vmem [shape: f32[2,32], index: 11, kind: input, shape index: {}]   ;;  %s3224_s12 = inlined_call_operand.hbm [shape: f32[2,8,32], index: 12, kind: output, shape index: {}]  }
   0x1   :  { %3236 = sst [smem:[#allocation6_spill]] %s3212_s0 }
   0x2   :  { %3237 = sst [smem:[#allocation7_spill]] %s3213_s1 }
   0x3   :  { %17 = vsyncpa [#allocation4], 0 }
   0x4   :  { %19 = vsyncpa [#allocation4 + $0x1], 0  ;;  %s2754_s21 = smov 0   ;;  %s2756_s22 = smov 0  }
   0x5   :  { %s2758_s23 = smov 0   ;;  %s2760_s24 = smov 0  }
   0x6 LB: > { %s2775_s25 = sadd.s32 4294967295, %s2670_s24   ;;  %s2119_s26 = sadd.s32 4294967294, %s2670_s24   ;;  %s2670_s24 = sphi %s2760_s24, %s3256_s24   ;;  %s2666_s23 = sphi %s2758_s23, %s3255_s23   ;;  %s2662_s22 = sphi %s2756_s22, %s3254_s22   ;;  %s2658_s21 = sphi %s2754_s21, %s3253_s21  }
   0x7   : > { %s2779_s27 = sadd.s32 1, %s2670_s24   ;;  %s289_s28 = sadd.s32 1, %s2666_s23 }
   0x8   : > { %s286_s29 = ssub.s32 %s2670_s24, %s2779_s27  ;;  %p299_p0 = scmp.ne.s32.totalorder %s2666_s23, %s2662_s22 }
   0x9   : > { %p287_p1 = scmp.eq.s32.totalorder %s286_s29, 0  ;;  %p300_p2 = scmp.eq.s32.totalorder %s2775_s25, 1 }
   0xa   : > { %p305_p3 = scmp.ne.s32.totalorder %s2662_s22, %s2658_s21  ;;  %p306_p4 = scmp.eq.s32.totalorder %s2119_s26, 1 }
   0xb   : > { %s2790_s30 = scalar_select %p287_p1, %s2666_s23, %s289_s28  }
   0xc   : > { %p2792_p5 = por %p300_p2, %p299_p0  ;;  %p2796_p6 = por %p306_p4, %p305_p3 }
   0xd   : > { %p2122_p7 = scmp.ge.s32.totalorder %s2670_s24, 1  ;;  %p364_p8 = scmp.lt.s32.totalorder %s2670_s24, 3 }
   0xf   : > { %p365_p9 = pnand %p2122_p7, %p364_p8 }
  0x10   : > { %p405_p10 = scmp.lt.s32.totalorder (!%p365_p9), %s2775_s25, 1  ;;  %vm411_vm0 = vcmask (!%p365_p9), 261120   ;;  %s3240_s0 = sld [smem:[#allocation6_spill]] (!%p365_p9)  ;;  %v2540_v7 = vld [vmem:[%s3215_s3] sm:$0xff] (!%p365_p9)   ;;  %v2672_v8 = vmov (!%p365_p9), 0.0   ;;  %vm2673_vm1 = vmmov (!%p365_p9), 0  }
  0x11   : > { %368 = sbr.rel (%p365_p9) target bundleno = 3547 (0xddb), region = 68  ;;  %2301 = vmatprep.subr.bf16.mxu1 (!%p365_p9), %v2672_v8  ;;  %2305 = vmatprep.mubr.msk.bf16.mxu1 (!%p365_p9), %vm2673_vm1, %v2672_v8  ;;  %v2541_v9 = vld [vmem:[%s3215_s3 + $0x8] sm:$0xff] (!%p365_p9)   ;;  %s3241_s1 = sld [smem:[#allocation7_spill]] (!%p365_p9)  ;;  %v2126_v16 = vld [vmem:[%s3214_s2] ss:$0 sm:$0xff] (!%p365_p9)  ;;  %vm502_vm2 = vcmask (!%p365_p9), 64512  }
  0x12   : > { %2302 = vmatpush3.bf16.msra.mxu1 (!%p365_p9), %v2540_v7  ;;  %2315 = vmatprep.subr.bf16.mxu0 (!%p365_p9), %v2672_v8  ;;  %s3234_s20 = smov (!%p365_p9), 96   ;;  %s2676_s26 = smov (!%p365_p9), 88   ;;  %vm566_vm3 = vcmask (!%p365_p9), 1043456   ;;  %vm611_vm4 = vcmask (!%p365_p9), 60416   ;;  %vm730_vm5 = vcmask (!%p365_p9), 126016   ;;  %vm849_vm6 = vcmask (!%p365_p9), 191616  }
  0x13   : > { %2303 = vmatprep.subr.bf16.mxu1 (!%p365_p9), %v2672_v8  ;;  %2317 = vmatprep.mubr.msk.bf16.mxu0 (!%p365_p9), %vm2673_vm1, %v2672_v8  ;;  %s3233_s28 = smov (!%p365_p9), 80   ;;  %s3230_s29 = smov (!%p365_p9), 112   ;;  %vm968_vm7 = vcmask (!%p365_p9), 257216  }
  0x14   : > { %s3226_s17 = smov (!%p365_p9), 64   ;;  %s3229_s18 = smov (!%p365_p9), 56  }
  0x16   : > { %2304 = vmatpush3.bf16.msra.mxu1 (!%p365_p9), %v2541_v9 }
  0x17   : > { %2309 = vmatprep.subr.bf16.mxu1 (!%p365_p9), %v2672_v8  ;;  %v2125_v14 = vld [vmem:[%s3241_s1] ss:$0 sm:$0xff] (!%p365_p9) }
  0x18   : > { %s406_s15 = scalar_select %p405_p10, %s2775_s25, 1 }
  0x1a   : > { %s2124_s16 = sshll.u32 %s406_s15, 3  ;;  %s3231_s15 = smov 72  }
  0x1b   : > { %s408_s19 = scalar_lea.vmem %s3240_s0, %s2124_s16  ;;  %s3225_s16 = smov 104  }
  0x1c   : > { %v2807_v0 = vld [vmem:[%s408_s19] sm:$0xff]  ;;  %s3232_s19 = smov 120  }
  0x1d   : > { %v412_v1 = vsel %vm411_vm0, %v2807_v0, 0.0 }
  0x1e   : > { %413 = vadd.xlane.f32.xlu0 %v412_v1 }
  0xab   : > { %v414_v2 = vpop.xlane.xlu0 %413 }
  0xac   : > { %v416_v3 = vmul.f32 0.03125, %v414_v2 }
  0xae   : > { %v417_v4 = vsub.f32 %v2807_v0, %v416_v3 }
  0xb0   : > { %v418_v5 = vmul.f32 %v417_v4, %v417_v4 }
  0xb2   : > { %v419_v6 = vsel %vm411_vm0, %v418_v5, 0.0 }
  0xb3   : > { %420 = vadd.xlane.f32.xlu0 %v419_v6 }
 0x140   : > { %v421_v10 = vpop.xlane.xlu0 %420 }
 0x141   : > { %v422_v11 = vmul.f32 0.03125, %v421_v10 }
 0x143   : > { %v423_v12 = vadd.f32 1e-05, %v422_v11 }
 0x145   : > { %2568 = vrsqrt.f32 %v423_v12 }
 0x14f   : > { %v2569_v13 = vpop.eup %2568 }
 0x150   : > { %v2830_v15 = vmul.f32 %v2569_v13, %v417_v4 }
 0x152   : > { %v431_v17 = vmul.f32 %v2125_v14, %v2830_v15 }
 0x154   : > { %v437_v18 = vadd.f32 %v2126_v16, %v431_v17 }
 0x156   : > { %v438_v19 = vpack.c.bf16 %v437_v18, %v437_v18 }
 0x158   : > { %2306 = vmatmul.mubr.msk.bf16.vlgmr.msra.gmra.mrb[0].mxu1 %vm411_vm0, %v438_v19 }
 0x159   : > { %2311 = vmatprep.mubr.msk.bf16.mxu1 %vm2673_vm1, %v2672_v8 }
 0x22b   : > { %v492_v20 = vpop.f32.mrb[0].mxu1 }
 0x22c   : > { %v2839_v21 = vpack.c.bf16 %v492_v20, %v492_v20  ;;  %v2307_v22 = vpop.f32.mrb[1].mxu1 }
 0x22d   : > { %v495_v23 = vpop.f32.mrb[2].mxu1 }
 0x22e   : > { %613 = vrot.lane.b32.xlu0 %v2839_v21, %s3232_s19  ;;  %500 = vrot.lane.b32.xlu1 %v2839_v21, %s3234_s20  ;;  %v2308_v24 = vpop.f32.mrb[3].mxu1  ;;  %s2685_s19 = smov 8   ;;  %s3243_s20 = smov 80  }
 0x232   : > { %615 = vrot.lane.b32.xlu1 %v2839_v21, %s2676_s26 }
 0x236   : > { %734 = vrot.lane.b32.xlu1 %v2839_v21, %s3233_s28  ;;  %s3244_s28 = smov 120  }
 0x23a   : > { %732 = vrot.lane.b32.xlu1 %v2839_v21, %s3230_s29  ;;  %s3245_s29 = smov 72  }
 0x23e   : > { %853 = vrot.lane.b32.xlu1 %v2839_v21, %s3231_s15  ;;  %s3246_s15 = smov 112  }
 0x242   : > { %851 = vrot.lane.b32.xlu1 %v2839_v21, %s3225_s16  ;;  %s3228_s16 = smov 48  }
 0x2a0   : > { %v501_v25 = vpop.permute.xlu1 %500  ;;  %v614_v30 = vpop.permute.xlu0 %613 }
 0x2a1   : > { %v507_v26 = vsel %vm502_vm2, %v501_v25, 0 }
 0x2a2   : > { %2310 = vmatpush3.bf16.xpose.msra.mxu1 %v507_v26 }
 0x2a3   : > { %2321 = vmatprep.subr.bf16.mxu1 %v2672_v8 }
 0x2a4   : > { %v616_v27 = vpop.permute.xlu1 %615 }
 0x2a5   : > { %v621_v28 = vsel %vm502_vm2, %v616_v27, 0 }
 0x2a8   : > { %v735_v29 = vpop.permute.xlu1 %734 }
 0x2a9   : > { %2312 = vmatmul.mubr.msk.bf16.vlgmr.msra.gmra.mrb[4].mxu1 %vm502_vm2, %v2839_v21  ;;  %v740_v32 = vsel %vm502_vm2, %v735_v29, 0 }
 0x2aa   : > { %2322 = vmatpush3.bf16.xpose.msra.mxu1 %v621_v28  ;;  %2323 = vmatprep.mubr.msk.bf16.mxu1 %vm2673_vm1, %v2672_v8 }
 0x2ab   : > { %2333 = vmatprep.subr.bf16.mxu1 %v2672_v8 }
 0x2ac   : > { %v733_v31 = vpop.permute.xlu1 %732 }
 0x2b0   : > { %v854_v33 = vpop.permute.xlu1 %853 }
 0x2b1   : > { %2324 = vmatmul.mubr.msk.bf16.vlgmr.msra.gmra.mrb[8].mxu1 %vm502_vm2, %v614_v30  ;;  %v859_v34 = vsel %vm502_vm2, %v854_v33, 0 }
 0x2b2   : > { %2334 = vmatpush3.bf16.xpose.msra.mxu1 %v740_v32  ;;  %2335 = vmatprep.mubr.msk.bf16.mxu1 %vm2673_vm1, %v2672_v8 }
 0x2b3   : > { %2345 = vmatprep.subr.bf16.mxu1 %v2672_v8 }
 0x2b4   : > { %v852_v35 = vpop.permute.xlu1 %851 }
 0x2b9   : > { %2336 = vmatmul.mubr.msk.bf16.vlgmr.msra.gmra.mrb[12].mxu1 %vm502_vm2, %v733_v31 }
 0x2ba   : > { %2346 = vmatpush3.bf16.xpose.msra.mxu1 %v859_v34  ;;  %2347 = vmatprep.mubr.msk.bf16.mxu1 %vm2673_vm1, %v2672_v8 }
 0x2bb   : > { %2357 = vmatprep.subr.bf16.mxu1 %v2672_v8 }
 0x2c1   : > { %2348 = vmatmul.mubr.msk.bf16.vlgmr.msra.gmra.mrb[16].mxu1 %vm502_vm2, %v852_v35 }
 0x2c2   : > { %2361 = vmatprep.mubr.msk.bf16.mxu1 %vm2673_vm1, %v2672_v8 }
 0x37c   : > { %v543_v36 = vpop.f32.mrb[4].mxu1 }
 0x37d   : > { %v2313_v37 = vpop.f32.mrb[5].mxu1  ;;  %v549_v38 = vsel %vm502_vm2, %v543_v36, -inf }
 0x37e   : > { %550 = vmax.xlane.f32.xlu1 %v549_v38  ;;  %v546_v39 = vpop.f32.mrb[6].mxu1  ;;  %v2145_v38 = vld [vmem:[%s3241_s1 + $0x1] ss:$0 sm:$0xff] }
 0x37f   : > { %v2314_v40 = vpop.f32.mrb[7].mxu1  ;;  %v2542_v39 = vld [vmem:[%s3215_s3 + $0x10] sm:$0xff]  }
 0x380   : > { %v1040_v40 = vmul.f32 %v2145_v38, %v2830_v15 }
 0x384   : > { %v657_v41 = vpop.f32.mrb[8].mxu1 }
 0x385   : > { %v2325_v42 = vpop.f32.mrb[9].mxu1  ;;  %v663_v43 = vsel %vm502_vm2, %v657_v41, -inf }
 0x386   : > { %664 = vmax.xlane.f32.xlu0 %v663_v43  ;;  %v660_v44 = vpop.f32.mrb[10].mxu1  ;;  %v2146_v42 = vld [vmem:[%s3214_s2 + $0x1] ss:$0 sm:$0xff]  ;;  %v2543_v43 = vld [vmem:[%s3215_s3 + $0x18] sm:$0xff]  }
 0x387   : > { %v2326_v45 = vpop.f32.mrb[11].mxu1  ;;  %v1046_v44 = vadd.f32 %v2146_v42, %v1040_v40 }
 0x389   : > { %v1047_v15 = vpack.c.bf16 %v1046_v44, %v1046_v44 }
 0x38c   : > { %v776_v46 = vpop.f32.mrb[12].mxu1 }
 0x38d   : > { %v2337_v47 = vpop.f32.mrb[13].mxu1  ;;  %v782_v48 = vsel %vm502_vm2, %v776_v46, -inf }
 0x38e   : > { %783 = vmax.xlane.f32.xlu1 %v782_v48  ;;  %v779_v49 = vpop.f32.mrb[14].mxu1 }
 0x38f   : > { %v2338_v50 = vpop.f32.mrb[15].mxu1 }
 0x394   : > { %v895_v51 = vpop.f32.mrb[16].mxu1 }
 0x395   : > { %v2349_v52 = vpop.f32.mrb[17].mxu1  ;;  %v901_v53 = vsel %vm502_vm2, %v895_v51, -inf }
 0x396   : > { %902 = vmax.xlane.f32.xlu0 %v901_v53  ;;  %v898_v54 = vpop.f32.mrb[18].mxu1 }
 0x397   : > { %v2350_v55 = vpop.f32.mrb[19].mxu1 }
 0x398   : > { %v2544_v55 = vld [vmem:[%s3216_s4] sm:$0xff]  }
 0x399   : > { %2358 = vmatpush3.bf16.msra.mxu1 %v2544_v55 }
 0x39a   : > { %2359 = vmatprep.subr.bf16.mxu1 %v2672_v8 }
 0x40b   : > { %v551_v56 = vpop.xlane.xlu1 %550 }
 0x40c   : > { %v552_v57 = vsub.f32 %v543_v36, %v551_v56  ;;  %v2545_v56 = vld [vmem:[%s3216_s4 + $0x8] sm:$0xff]  }
 0x40d   : > { %2360 = vmatpush3.bf16.msra.mxu1 %v2545_v56 }
 0x40e   : > { %v553_v58 = vmul.f32 1.442695, %v552_v57  ;;  %2373 = vmatprep.subr.bf16.mxu1 %v2672_v8 }
 0x410   : > { %2570 = vpow2.f32 %v553_v58 }
 0x413   : > { %v665_v59 = vpop.xlane.xlu0 %664 }
 0x414   : > { %v666_v60 = vsub.f32 %v657_v41, %v665_v59 }
 0x416   : > { %v667_v61 = vmul.f32 1.442695, %v666_v60 }
 0x418   : > { %2572 = vpow2.f32 %v667_v61 }
 0x41a   : > { %v2571_v62 = vpop.eup %2570 }
 0x41b   : > { %v555_v63 = vsel %vm502_vm2, %v2571_v62, 0.0  ;;  %v784_v9 = vpop.xlane.xlu1 %783 }
 0x41c   : > { %556 = vadd.xlane.f32.xlu1 %v555_v63  ;;  %v785_v10 = vsub.f32 %v776_v46, %v784_v9 }
 0x41e   : > { %v786_v11 = vmul.f32 1.442695, %v785_v10 }
 0x422   : > { %v2573_v1 = vpop.eup %2572 }
 0x423   : > { %v903_v2 = vpop.xlane.xlu0 %902  ;;  %v669_v3 = vsel %vm502_vm2, %v2573_v1, 0.0 }
 0x424   : > { %v904_v4 = vsub.f32 %v895_v51, %v903_v2  ;;  %670 = vadd.xlane.f32.xlu0 %v669_v3 }
 0x426   : > { %v905_v5 = vmul.f32 1.442695, %v904_v4 }
 0x428   : > { %2574 = vpow2.f32 %v905_v5 }
 0x429   : > { %2576 = vpow2.f32 %v786_v11 }
 0x42d   : > { %561 = vrot.lane.b32.xlu1 %v2839_v21, %s3226_s17  ;;  %s3227_s17 = smov 40  }
 0x432   : > { %v2575_v6 = vpop.eup %2574 }
 0x433   : > { %v907_v7 = vsel %vm502_vm2, %v2575_v6, 0.0  ;;  %v2577_v12 = vpop.eup %2576 }
 0x434   : > { %908 = vadd.xlane.f32.xlu0 %v907_v7  ;;  %v788_v13 = vsel %vm502_vm2, %v2577_v12, 0.0 }
 0x44a   : > { %675 = vrot.lane.b32.xlu0 %v2839_v21, %s3229_s18  ;;  %s3242_s18 = smov 96  }
 0x451   : > { %789 = vadd.xlane.f32.xlu1 %v788_v13 }
 0x462   : > { %794 = vrot.lane.b32.xlu1 %v2839_v21, %s3228_s16  ;;  %s2686_s16 = smov 16  }
 0x466   : > { %913 = vrot.lane.b32.xlu1 %v2839_v21, %s3227_s17  ;;  %s3235_s17 = smov 24  }
 0x4a9   : > { %v557_v14 = vpop.xlane.xlu1 %556 }
 0x4aa   : > { %2578 = vrcp.f32 %v557_v14 }
 0x4ad   : > { %v562_v16 = vpop.permute.xlu1 %561 }
 0x4ae   : > { %v568_v17 = vsel %vm566_vm3, %v562_v16, 0 }
 0x4af   : > { %2316 = vmatpush3.bf16.msra.mxu0 %v568_v17 }
 0x4b0   : > { %2327 = vmatprep.subr.bf16.mxu0 %v2672_v8 }
 0x4b1   : > { %v671_v19 = vpop.xlane.xlu0 %670 }
 0x4b2   : > { %2580 = vrcp.f32 %v671_v19 }
 0x4b4   : > { %v2579_v18 = vpop.eup %2578 }
 0x4b5   : > { %v559_v20 = vmul.f32 %v2579_v18, %v2571_v62 }
 0x4b7   : > { %v560_v22 = vpack.c.bf16 %v559_v20, %v559_v20 }
 0x4b9   : > { %2318 = vmatmul.mubr.msk.bf16.vlgmr.msra.gmra.mrb[0].mxu0 %vm502_vm2, %v560_v22 }
 0x4ba   : > { %2329 = vmatprep.mubr.msk.bf16.mxu0 %vm2673_vm1, %v2672_v8 }
 0x4bc   : > { %v2581_v21 = vpop.eup %2580 }
 0x4bd   : > { %v673_v24 = vmul.f32 %v2581_v21, %v2573_v1 }
 0x4bf   : > { %v674_v27 = vpack.c.bf16 %v673_v24, %v673_v24 }
 0x4c1   : > { %v909_v23 = vpop.xlane.xlu0 %908 }
 0x4c5   : > { %v676_v25 = vpop.permute.xlu0 %675 }
 0x4c6   : > { %v681_v26 = vsel %vm566_vm3, %v676_v25, 0 }
 0x4c7   : > { %2328 = vmatpush3.bf16.msra.mxu0 %v681_v26 }
 0x4c8   : > { %2339 = vmatprep.subr.bf16.mxu0 %v2672_v8 }
 0x4ca   : > { %2330 = vmatmul.mubr.msk.bf16.vlgmr.msra.gmra.mrb[4].mxu0 %vm502_vm2, %v674_v27 }
 0x4cb   : > { %2341 = vmatprep.mubr.msk.bf16.mxu0 %vm2673_vm1, %v2672_v8 }
 0x4de   : > { %v790_v28 = vpop.xlane.xlu1 %789 }
 0x4df   : > { %2582 = vrcp.f32 %v790_v28 }
 0x4e0   : > { %2584 = vrcp.f32 %v909_v23 }
 0x4e2   : > { %v795_v29 = vpop.permute.xlu1 %794 }
 0x4e3   : > { %v800_v30 = vsel %vm566_vm3, %v795_v29, 0 }
 0x4e4   : > { %2340 = vmatpush3.bf16.msra.mxu0 %v800_v30 }
 0x4e5   : > { %2351 = vmatprep.subr.bf16.mxu0 %v2672_v8 }
 0x4e6   : > { %v914_v33 = vpop.permute.xlu1 %913 }
 0x4e7   : > { %v919_v36 = vsel %vm566_vm3, %v914_v33, 0 }
 0x4e9   : > { %v2583_v31 = vpop.eup %2582 }
 0x4ea   : > { %v792_v32 = vmul.f32 %v2583_v31, %v2577_v12  ;;  %v2585_v35 = vpop.eup %2584 }
 0x4eb   : > { %v911_v37 = vmul.f32 %v2585_v35, %v2575_v6 }
 0x4ec   : > { %v793_v34 = vpack.c.bf16 %v792_v32, %v792_v32 }
 0x4ed   : > { %v912_v41 = vpack.c.bf16 %v911_v37, %v911_v37 }
 0x4ee   : > { %2342 = vmatmul.mubr.msk.bf16.vlgmr.msra.gmra.mrb[8].mxu0 %vm502_vm2, %v793_v34 }
 0x4ef   : > { %2352 = vmatpush3.bf16.msra.mxu0 %v919_v36  ;;  %2353 = vmatprep.mubr.msk.bf16.mxu0 %vm2673_vm1, %v2672_v8 }
 0x4f0   : > { %2365 = vmatprep.subr.bf16.mxu0 %v2672_v8 }
 0x4f6   : > { %2354 = vmatmul.mubr.msk.bf16.vlgmr.msra.gmra.mrb[12].mxu0 %vm502_vm2, %v912_v41 }
 0x4f7   : > { %2366 = vmatpush3.bf16.msra.mxu0 %v2542_v39  ;;  %2369 = vmatprep.mubr.msk.bf16.mxu0 %vm2673_vm1, %v2672_v8 }
 0x4f8   : > { %2367 = vmatprep.subr.bf16.mxu0 %v2672_v8 }
 0x4fb   : > { %2368 = vmatpush3.bf16.msra.mxu0 %v2543_v43 }
 0x4fc   : > { %2379 = vmatprep.subr.bf16.mxu0 %v2672_v8 }
 0x4fe   : > { %2370 = vmatmul.mubr.msk.bf16.vlgmr.msra.gmra.mrb[16].mxu0 %vm411_vm0, %v1047_v15 }
 0x4ff   : > { %2381 = vmatprep.mubr.msk.bf16.mxu0 %vm2673_vm1, %v2672_v8 }
 0x58c   : > { %v604_v45 = vpop.f32.mrb[0].mxu0 }
 0x58d   : > { %v610_v46 = vpack.c.bf16 %v604_v45, %v604_v45  ;;  %v2319_v47 = vpop.f32.mrb[1].mxu0 }
 0x58e   : > { %v607_v48 = vpop.f32.mrb[2].mxu0 }
 0x58f   : > { %612 = vst.msk [vmem:[#allocation2] sm:$0xf] %vm611_vm4, %v610_v46  ;;  %v2320_v49 = vpop.f32.mrb[3].mxu0 }
 0x59d   : > { %v717_v50 = vpop.f32.mrb[4].mxu0 }
 0x59e   : > { %v2227_v51 = vpack.c.bf16 %v717_v50, %v717_v50  ;;  %v2331_v52 = vpop.f32.mrb[5].mxu0 }
 0x59f   : > { %v720_v53 = vpop.f32.mrb[6].mxu0 }
 0x5a0   : > { %727 = vrot.lane.b32.xlu0 %v2227_v51, %s2685_s19  ;;  %v2332_v54 = vpop.f32.mrb[7].mxu0 }
 0x5c1   : > { %v836_v57 = vpop.f32.mrb[8].mxu0 }
 0x5c2   : > { %v2228_v58 = vpack.c.bf16 %v836_v57, %v836_v57  ;;  %v2343_v59 = vpop.f32.mrb[9].mxu0 }
 0x5c3   : > { %v839_v60 = vpop.f32.mrb[10].mxu0 }
 0x5c4   : > { %846 = vrot.lane.b32.xlu1 %v2228_v58, %s2686_s16  ;;  %v2344_v61 = vpop.f32.mrb[11].mxu0 }
 0x5c9   : > { %v955_v62 = vpop.f32.mrb[12].mxu0 }
 0x5ca   : > { %v2229_v63 = vpack.c.bf16 %v955_v62, %v955_v62  ;;  %v2355_v1 = vpop.f32.mrb[13].mxu0 }
 0x5cb   : > { %v958_v2 = vpop.f32.mrb[14].mxu0 }
 0x5cc   : > { %965 = vrot.lane.b32.xlu0 %v2229_v63, %s3235_s17  ;;  %v2356_v3 = vpop.f32.mrb[15].mxu0  ;;  %s3247_s17 = smov 104  }
 0x5d1   : > { %v1102_v4 = vpop.f32.mrb[16].mxu0 }
 0x5d2   : > { %v2942_v5 = vpack.c.bf16 %v1102_v4, %v1102_v4  ;;  %v2371_v6 = vpop.f32.mrb[17].mxu0 }
 0x5d3   : > { %v1105_v7 = vpop.f32.mrb[18].mxu0 }
 0x5d4   : > { %1222 = vrot.lane.b32.xlu0 %v2942_v5, %s2676_s26  ;;  %1110 = vrot.lane.b32.xlu1 %v2942_v5, %s3242_s18  ;;  %v2372_v9 = vpop.f32.mrb[19].mxu0  ;;  %s3248_s26 = smov 64   ;;  %s3250_s18 = smov 48  }
 0x5d8   : > { %1340 = vrot.lane.b32.xlu0 %v2942_v5, %s3243_s20  ;;  %1220 = vrot.lane.b32.xlu1 %v2942_v5, %s3244_s28  ;;  %s3251_s20 = smov 40  }
 0x5dc   : > { %1458 = vrot.lane.b32.xlu0 %v2942_v5, %s3245_s29  ;;  %1338 = vrot.lane.b32.xlu1 %v2942_v5, %s3246_s15 }
 0x5e0   : > { %1456 = vrot.lane.b32.xlu1 %v2942_v5, %s3247_s17  ;;  %s3249_s17 = smov 56  }
 0x612   : > { %v728_v10 = vpop.permute.xlu0 %727 }
 0x613   : > { %731 = vst.msk [vmem:[#allocation2] sm:$0xf] %vm730_vm5, %v728_v10 }
 0x636   : > { %v847_v11 = vpop.permute.xlu1 %846 }
 0x637   : > { %850 = vst.msk [vmem:[#allocation2] sm:$0xf] %vm849_vm6, %v847_v11 }
 0x63e   : > { %v966_v12 = vpop.permute.xlu0 %965 }
 0x63f   : > { %969 = vst.msk [vmem:[#allocation2] sm:$0xf] %vm968_vm7, %v966_v12 }
 0x646   : > { %v1111_v13 = vpop.permute.xlu1 %1110  ;;  %v970_v14 = vld [vmem:[#allocation2] sm:$0xf]  ;;  %v1223_v17 = vpop.permute.xlu0 %1222 }
 0x647   : > { %v1116_v16 = vsel %vm502_vm2, %v1111_v13, 0  ;;  %2362 = vmatmul.mubr.msk.bf16.vlgmr.msra.gmra.mrb[20].mxu1 %vm411_vm0, %v970_v14  ;;  %v1228_v18 = vsel %vm502_vm2, %v1223_v17, 0 }
 0x648   : > { %2374 = vmatpush3.bf16.xpose.msra.mxu1 %v1116_v16  ;;  %2375 = vmatprep.mubr.msk.bf16.mxu1 %vm2673_vm1, %v2672_v8 }
 0x649   : > { %2385 = vmatprep.subr.bf16.mxu1 %v2672_v8 }
 0x64a   : > { %v1341_v19 = vpop.permute.xlu0 %1340  ;;  %v1221_v20 = vpop.permute.xlu1 %1220 }
 0x64b   : > { %v1346_v22 = vsel %vm502_vm2, %v1341_v19, 0 }
 0x64e   : > { %v1459_v21 = vpop.permute.xlu0 %1458  ;;  %v1339_v23 = vpop.permute.xlu1 %1338 }
 0x64f   : > { %2376 = vmatmul.mubr.msk.bf16.vlgmr.msra.gmra.mrb[24].mxu1 %vm502_vm2, %v2942_v5  ;;  %v1464_v24 = vsel %vm502_vm2, %v1459_v21, 0 }
 0x650   : > { %2386 = vmatpush3.bf16.xpose.msra.mxu1 %v1228_v18  ;;  %2387 = vmatprep.mubr.msk.bf16.mxu1 %vm2673_vm1, %v2672_v8 }
 0x651   : > { %2397 = vmatprep.subr.bf16.mxu1 %v2672_v8 }
 0x652   : > { %v1457_v25 = vpop.permute.xlu1 %1456 }
 0x657   : > { %2388 = vmatmul.mubr.msk.bf16.vlgmr.msra.gmra.mrb[28].mxu1 %vm502_vm2, %v1221_v20 }
 0x658   : > { %2398 = vmatpush3.bf16.xpose.msra.mxu1 %v1346_v22  ;;  %2399 = vmatprep.mubr.msk.bf16.mxu1 %vm2673_vm1, %v2672_v8 }
 0x659   : > { %2409 = vmatprep.subr.bf16.mxu1 %v2672_v8 }
 0x65f   : > { %2400 = vmatmul.mubr.msk.bf16.vlgmr.msra.gmra.mrb[32].mxu1 %vm502_vm2, %v1339_v23 }
 0x660   : > { %2410 = vmatpush3.bf16.xpose.msra.mxu1 %v1464_v24  ;;  %2411 = vmatprep.mubr.msk.bf16.mxu1 %vm2673_vm1, %v2672_v8 }
 0x661   : > { %2421 = vmatprep.subr.bf16.mxu1 %v2672_v8 }
 0x667   : > { %2412 = vmatmul.mubr.msk.bf16.vlgmr.msra.gmra.mrb[36].mxu1 %vm502_vm2, %v1457_v25 }
 0x668   : > { %2425 = vmatprep.mubr.msk.bf16.mxu1 %vm2673_vm1, %v2672_v8 }
 0x71a   : > { %v2985_v26 = vpop.f32.mrb[20].mxu1 }
 0x71b   : > { %v2363_v27 = vpop.f32.mrb[21].mxu1 }
 0x71c   : > { %v1032_v28 = vpop.f32.mrb[22].mxu1 }
 0x71d   : > { %v2364_v29 = vpop.f32.mrb[23].mxu1 }
 0x722   : > { %v1152_v30 = vpop.f32.mrb[24].mxu1 }
 0x723   : > { %v2377_v31 = vpop.f32.mrb[25].mxu1  ;;  %v1158_v32 = vsel %vm502_vm2, %v1152_v30, -inf }
 0x724   : > { %1159 = vmax.xlane.f32.xlu0 %v1158_v32  ;;  %v1155_v33 = vpop.f32.mrb[26].mxu1 }
 0x725   : > { %v2378_v34 = vpop.f32.mrb[27].mxu1 }
 0x72a   : > { %v1264_v35 = vpop.f32.mrb[28].mxu1 }
 0x72b   : > { %v2389_v36 = vpop.f32.mrb[29].mxu1  ;;  %v1270_v37 = vsel %vm502_vm2, %v1264_v35, -inf }
 0x72c   : > { %1271 = vmax.xlane.f32.xlu1 %v1270_v37  ;;  %v1267_v38 = vpop.f32.mrb[30].mxu1 }
 0x72d   : > { %v2390_v39 = vpop.f32.mrb[31].mxu1 }
 0x732   : > { %v1382_v40 = vpop.f32.mrb[32].mxu1 }
 0x733   : > { %v2401_v41 = vpop.f32.mrb[33].mxu1  ;;  %v1388_v42 = vsel %vm502_vm2, %v1382_v40, -inf }
 0x734   : > { %1389 = vmax.xlane.f32.xlu0 %v1388_v42  ;;  %v1385_v43 = vpop.f32.mrb[34].mxu1 }
 0x735   : > { %v2402_v44 = vpop.f32.mrb[35].mxu1  ;;  %v2546_v43 = vld [vmem:[%s3216_s4 + $0x10] sm:$0xff]  }
 0x736   : > { %2422 = vmatpush3.bf16.msra.mxu1 %v2546_v43  ;;  %v2564_v43 = vld [vmem:[%s3222_s10 + $0x38] sm:$0xff]  }
 0x737   : > { %2423 = vmatprep.subr.bf16.mxu1 %v2672_v8 }
 0x73a   : > { %v1500_v15 = vpop.f32.mrb[36].mxu1 }
 0x73b   : > { %v2413_v45 = vpop.f32.mrb[37].mxu1  ;;  %v1506_v46 = vsel %vm502_vm2, %v1500_v15, -inf }
 0x73c   : > { %1507 = vmax.xlane.f32.xlu0 %v1506_v46  ;;  %v1503_v47 = vpop.f32.mrb[38].mxu1 }
 0x73d   : > { %v2414_v48 = vpop.f32.mrb[39].mxu1 }
 0x7b1   : > { %v1160_v49 = vpop.xlane.xlu0 %1159 }
 0x7b2   : > { %v1161_v50 = vsub.f32 %v1152_v30, %v1160_v49 }
 0x7b4   : > { %v1162_v51 = vmul.f32 1.442695, %v1161_v50 }
 0x7b6   : > { %2586 = vpow2.f32 %v1162_v51 }
 0x7b9   : > { %v1272_v52 = vpop.xlane.xlu1 %1271 }
 0x7ba   : > { %v1273_v53 = vsub.f32 %v1264_v35, %v1272_v52 }
 0x7bc   : > { %v1274_v54 = vmul.f32 1.442695, %v1273_v53 }
 0x7be   : > { %2588 = vpow2.f32 %v1274_v54 }
 0x7c0   : > { %v2587_v55 = vpop.eup %2586 }
 0x7c1   : > { %v1164_v56 = vsel %vm502_vm2, %v2587_v55, 0.0  ;;  %v1390_v57 = vpop.xlane.xlu0 %1389 }
 0x7c2   : > { %1165 = vadd.xlane.f32.xlu1 %v1164_v56  ;;  %v1391_v2 = vsub.f32 %v1382_v40, %v1390_v57 }
 0x7c4   : > { %v1392_v3 = vmul.f32 1.442695, %v1391_v2 }
 0x7c8   : > { %v2589_v58 = vpop.eup %2588 }
 0x7c9   : > { %v1508_v59 = vpop.xlane.xlu0 %1507  ;;  %v1276_v60 = vsel %vm502_vm2, %v2589_v58, 0.0 }
 0x7ca   : > { %v1509_v61 = vsub.f32 %v1500_v15, %v1508_v59  ;;  %1277 = vadd.xlane.f32.xlu0 %v1276_v60  ;;  %v2547_v15 = vld [vmem:[%s3216_s4 + $0x18] sm:$0xff]  }
 0x7cb   : > { %2424 = vmatpush3.bf16.msra.mxu1 %v2547_v15  ;;  %v2566_v15 = vld [vmem:[%s3222_s10 + $0x70] sm:$0xff]  }
 0x7cc   : > { %v1510_v62 = vmul.f32 1.442695, %v1509_v61  ;;  %2437 = vmatprep.subr.bf16.mxu1 %v2672_v8  ;;  %v2172_v61 = vld [vmem:[%s3217_s5 + $0x1] ss:$0 sm:$0xff] }
 0x7ce   : > { %2590 = vpow2.f32 %v1510_v62 }
 0x7cf   : > { %2592 = vpow2.f32 %v1392_v3 }
 0x7d3   : > { %1170 = vrot.lane.b32.xlu1 %v2942_v5, %s3248_s26 }
 0x7d8   : > { %v2591_v63 = vpop.eup %2590 }
 0x7d9   : > { %v1512_v1 = vsel %vm502_vm2, %v2591_v63, 0.0  ;;  %v2593_v4 = vpop.eup %2592 }
 0x7da   : > { %1513 = vadd.xlane.f32.xlu0 %v1512_v1  ;;  %v1394_v6 = vsel %vm502_vm2, %v2593_v4, 0.0 }
 0x7f0   : > { %1282 = vrot.lane.b32.xlu0 %v2942_v5, %s3249_s17 }
 0x7f7   : > { %1395 = vadd.xlane.f32.xlu1 %v1394_v6 }
 0x808   : > { %1400 = vrot.lane.b32.xlu1 %v2942_v5, %s3250_s18  ;;  %s402_s18 = sand.u32 1, %s2662_s22  }
 0x809   : > { %s2123_s29 = sshll.u32 %s402_s18, 3  ;;  %s2047_s15 = scalar_lea.sflag [#allocation4], %s402_s18 }
 0x80c   : > { %1518 = vrot.lane.b32.xlu1 %v2942_v5, %s3251_s20 }
 0x84f   : > { %v1166_v7 = vpop.xlane.xlu1 %1165 }
 0x850   : > { %2594 = vrcp.f32 %v1166_v7 }
 0x853   : > { %v1171_v9 = vpop.permute.xlu1 %1170 }
 0x854   : > { %v1176_v10 = vsel %vm566_vm3, %v1171_v9, 0 }
 0x855   : > { %2380 = vmatpush3.bf16.msra.mxu0 %v1176_v10 }
 0x856   : > { %2391 = vmatprep.subr.bf16.mxu0 %v2672_v8 }
 0x857   : > { %v1278_v12 = vpop.xlane.xlu0 %1277 }
 0x858   : > { %2596 = vrcp.f32 %v1278_v12  ;;  %v2548_v12 = vld [vmem:[%s3220_s8] sm:$0xff]  }
 0x85a   : > { %v2595_v11 = vpop.eup %2594 }
 0x85b   : > { %v1168_v13 = vmul.f32 %v2595_v11, %v2587_v55 }
 0x85d   : > { %v1169_v14 = vpack.c.bf16 %v1168_v13, %v1168_v13  ;;  %v2552_v13 = vld [vmem:[%s3222_s10] sm:$0xff]  }
 0x85f   : > { %2382 = vmatmul.mubr.msk.bf16.vlgmr.msra.gmra.mrb[20].mxu0 %vm502_vm2, %v1169_v14  ;;  %v2553_v14 = vld [vmem:[%s3222_s10 + $0x8] sm:$0xff]  }
 0x860   : > { %2393 = vmatprep.mubr.msk.bf16.mxu0 %vm2673_vm1, %v2672_v8 }
 0x862   : > { %v2597_v16 = vpop.eup %2596 }
 0x863   : > { %v1280_v17 = vmul.f32 %v2597_v16, %v2589_v58  ;;  %v2141_v58 = vld [vmem:[%s3217_s5] ss:$0 sm:$0xff]  ;;  %v2554_v16 = vld [vmem:[%s3222_s10 + $0x10] sm:$0xff]  }
 0x864   : > { %v1030_v59 = vadd.f32 %v2141_v58, %v2985_v26 }
 0x865   : > { %v1281_v20 = vpack.c.bf16 %v1280_v17, %v1280_v17 }
 0x867   : > { %v1514_v5 = vpop.xlane.xlu0 %1513 }
 0x86b   : > { %v1283_v18 = vpop.permute.xlu0 %1282 }
 0x86c   : > { %v1288_v19 = vsel %vm566_vm3, %v1283_v18, 0 }
 0x86d   : > { %2392 = vmatpush3.bf16.msra.mxu0 %v1288_v19 }
 0x86e   : > { %2403 = vmatprep.subr.bf16.mxu0 %v2672_v8 }
 0x870   : > { %2394 = vmatmul.mubr.msk.bf16.vlgmr.msra.gmra.mrb[24].mxu0 %vm502_vm2, %v1281_v20  ;;  %v2173_v20 = vld [vmem:[%s3218_s6] ss:$0 sm:$0xff] }
 0x871   : > { %2405 = vmatprep.mubr.msk.bf16.mxu0 %vm2673_vm1, %v2672_v8 }
 0x884   : > { %v1396_v22 = vpop.xlane.xlu1 %1395 }
 0x885   : > { %2598 = vrcp.f32 %v1396_v22 }
 0x886   : > { %2600 = vrcp.f32 %v1514_v5 }
 0x888   : > { %v1401_v21 = vpop.permute.xlu1 %1400 }
 0x889   : > { %v1406_v23 = vsel %vm566_vm3, %v1401_v21, 0  ;;  %v2174_v21 = vld [vmem:[%s3219_s7] ss:$0 sm:$0xff] }
 0x88a   : > { %2404 = vmatpush3.bf16.msra.mxu0 %v1406_v23 }
 0x88b   : > { %2415 = vmatprep.subr.bf16.mxu0 %v2672_v8 }
 0x88c   : > { %v1519_v27 = vpop.permute.xlu1 %1518 }
 0x88d   : > { %v1524_v30 = vsel %vm566_vm3, %v1519_v27, 0  ;;  %v2550_v27 = vld [vmem:[%s3220_s8 + $0x10] sm:$0xff]  }
 0x88f   : > { %v2599_v24 = vpop.eup %2598 }
 0x890   : > { %v1398_v25 = vmul.f32 %v2599_v24, %v2593_v4  ;;  %v2601_v29 = vpop.eup %2600  ;;  %v2188_v24 = vld [vmem:[%s3218_s6 + $0x1] ss:$0 sm:$0xff] }
 0x891   : > { %v1516_v31 = vmul.f32 %v2601_v29, %v2591_v63 }
 0x892   : > { %v1399_v28 = vpack.c.bf16 %v1398_v25, %v1398_v25 }
 0x893   : > { %v1517_v32 = vpack.c.bf16 %v1516_v31, %v1516_v31  ;;  %v2551_v31 = vld [vmem:[%s3220_s8 + $0x18] sm:$0xff]  }
 0x894   : > { %2406 = vmatmul.mubr.msk.bf16.vlgmr.msra.gmra.mrb[28].mxu0 %vm502_vm2, %v1399_v28 }
 0x895   : > { %2416 = vmatpush3.bf16.msra.mxu0 %v1524_v30  ;;  %2417 = vmatprep.mubr.msk.bf16.mxu0 %vm2673_vm1, %v2672_v8  ;;  %v2189_v30 = vld [vmem:[%s3219_s7 + $0x1] ss:$0 sm:$0xff] }
 0x896   : > { %2429 = vmatprep.subr.bf16.mxu0 %v2672_v8 }
 0x89c   : > { %2418 = vmatmul.mubr.msk.bf16.vlgmr.msra.gmra.mrb[32].mxu0 %vm502_vm2, %v1517_v32 }
 0x89d   : > { %2433 = vmatprep.mubr.msk.bf16.mxu0 %vm2673_vm1, %v2672_v8  ;;  %2430 = vmatpush3.bf16.msra.mxu0 %v2548_v12  ;;  %v2179_v12 = vld [vmem:[%s3223_s11] ss:$0 sm:$0xff] }
 0x89e   : > { %2431 = vmatprep.subr.bf16.mxu0 %v2672_v8 }
 0x932   : > { %v1212_v33 = vpop.f32.mrb[20].mxu0 }
 0x933   : > { %v1218_v34 = vpack.c.bf16 %v1212_v33, %v1212_v33  ;;  %v2383_v35 = vpop.f32.mrb[21].mxu0  ;;  %v2555_v33 = vld [vmem:[%s3222_s10 + $0x40] sm:$0xff]  }
 0x934   : > { %v1215_v36 = vpop.f32.mrb[22].mxu0  ;;  %v2556_v35 = vld [vmem:[%s3222_s10 + $0x18] sm:$0xff]  }
 0x935   : > { %1219 = vst.msk [vmem:[#allocation2] sm:$0xf] %vm611_vm4, %v1218_v34  ;;  %v2384_v37 = vpop.f32.mrb[23].mxu0  ;;  %v2557_v36 = vld [vmem:[%s3222_s10 + $0x48] sm:$0xff]  }
 0x936   : > { %v2558_v37 = vld [vmem:[%s3222_s10 + $0x20] sm:$0xff]  }
 0x943   : > { %v1324_v38 = vpop.f32.mrb[24].mxu0 }
 0x944   : > { %v2230_v39 = vpack.c.bf16 %v1324_v38, %v1324_v38  ;;  %v2395_v40 = vpop.f32.mrb[25].mxu0  ;;  %v2559_v38 = vld [vmem:[%s3222_s10 + $0x50] sm:$0xff]  }
 0x945   : > { %v1327_v41 = vpop.f32.mrb[26].mxu0  ;;  %v2561_v40 = vld [vmem:[%s3222_s10 + $0x58] sm:$0xff]  }
 0x946   : > { %1334 = vrot.lane.b32.xlu0 %v2230_v39, %s2685_s19  ;;  %v2396_v42 = vpop.f32.mrb[27].mxu0  ;;  %s3252_s19 = smov 24   ;;  %v2560_v39 = vld [vmem:[%s3222_s10 + $0x28] sm:$0xff]   ;;  %v2562_v41 = vld [vmem:[%s3222_s10 + $0x30] sm:$0xff]  }
 0x947   : > { %v2563_v42 = vld [vmem:[%s3222_s10 + $0x60] sm:$0xff]  }
 0x967   : > { %v1442_v44 = vpop.f32.mrb[28].mxu0 }
 0x968   : > { %v2231_v45 = vpack.c.bf16 %v1442_v44, %v1442_v44  ;;  %v2407_v46 = vpop.f32.mrb[29].mxu0  ;;  %v2565_v44 = vld [vmem:[%s3222_s10 + $0x68] sm:$0xff]  }
 0x969   : > { %v1445_v47 = vpop.f32.mrb[30].mxu0  ;;  %v2175_v46 = vld [vmem:[%s3221_s9] ss:$0 sm:$0xff] }
 0x96a   : > { %1452 = vrot.lane.b32.xlu1 %v2231_v45, %s2686_s16  ;;  %v2408_v48 = vpop.f32.mrb[31].mxu0  ;;  %v2567_v45 = vld [vmem:[%s3222_s10 + $0x78] sm:$0xff]   ;;  %s404_s16 = scalar_lea.vmem [#allocation3], %s2123_s29  ;;  %s2688_s29 = smov [#allocation3]  }
 0x96b   : > { %s2060_s17 = sshll.u32 %s404_s16, 4  ;;  %s2612_s26 = sshll.u32 %s2688_s29, 4  ;;  %s3171_s17 = int_to_ptr.vmem [resolvable:$true] %s2060_s17  ;;  %s2613_s26 = int_to_ptr.vmem [resolvable:$false] %s2612_s26 }
 0x96c   : > { %s2614_s1 = scalar_lea.vmem %s2613_s26, 256  ;;  %p2615_p0 = scmp.lt.s32.totalorder %s3171_s17, %s2613_s26 }
 0x96f   : > { %v1560_v49 = vpop.f32.mrb[32].mxu0 }
 0x970   : > { %v2232_v50 = vpack.c.bf16 %v1560_v49, %v1560_v49  ;;  %v2419_v51 = vpop.f32.mrb[33].mxu0 }
 0x971   : > { %v1563_v52 = vpop.f32.mrb[34].mxu0 }
 0x972   : > { %1570 = vrot.lane.b32.xlu0 %v2232_v50, %s3252_s19  ;;  %v2420_v53 = vpop.f32.mrb[35].mxu0  ;;  %s2224_s19 = sshll.u32 %s2775_s25, 7  ;;  %s2608_s25 = scalar_lea.vmem %s3171_s17, 128 }
 0x973   : > { %s3169_s0 = scalar_lea.hbm %s3224_s12, %s2224_s19  ;;  %p2609_p11 = scmp.ne.s32.totalorder %s3171_s17, %s2608_s25 }
 0x974   : > { %p2616_p1 = scmp.lt.s32.totalorder %s2614_s1, %s2608_s25 }
 0x975   : > { %p2610_p12 = pnand %p2609_p11, %p2792_p5 }
 0x976   : > { %p2617_p2 = por %p2616_p1, %p2615_p0 }
 0x977   : > { %p2611_p13 = pneg %p2610_p12 }
 0x979   : > { %p2618_p3 = pnand %p2617_p2, %p2611_p13 }
 0x9b8   : > { %v1335_v54 = vpop.permute.xlu0 %1334 }
 0x9b9   : > { %1337 = vst.msk [vmem:[#allocation2] sm:$0xf] %vm730_vm5, %v1335_v54 }
 0x9dc   : > { %v1453_v55 = vpop.permute.xlu1 %1452 }
 0x9dd   : > { %1455 = vst.msk [vmem:[#allocation2] sm:$0xf] %vm849_vm6, %v1453_v55 }
 0x9e4   : > { %v1571_v56 = vpop.permute.xlu0 %1570 }
 0x9e5   : > { %1573 = vst.msk [vmem:[#allocation2] sm:$0xf] %vm968_vm7, %v1571_v56 }
 0x9ec   : > { %v1574_v57 = vld [vmem:[#allocation2] sm:$0xf] }
 0x9ed   : > { %2426 = vmatmul.mubr.msk.bf16.vlgmr.msra.gmra.mrb[40].mxu1 %vm411_vm0, %v1574_v57 }
 0x9ee   : > { %2453 = vmatprep.mubr.msk.bf16.mxu1 %vm2673_vm1, %v2672_v8  ;;  %2438 = vmatpush3.bf16.msra.mxu1 %v2552_v13 }
 0x9ef   : > { %2439 = vmatprep.subr.bf16.mxu1 %v2672_v8 }
 0x9f2   : > { %2440 = vmatpush3.bf16.msra.mxu1 %v2553_v14  ;;  %v2222_v14 = vld [vmem:[%s3223_s11 + $0x1] ss:$0 sm:$0xff] }
 0x9f3   : > { %2441 = vmatprep.subr.bf16.mxu1 %v2672_v8 }
 0x9f6   : > { %2442 = vmatpush3.bf16.msra.mxu1 %v2554_v16 }
 0x9f7   : > { %2443 = vmatprep.subr.bf16.mxu1 %v2672_v8 }
 0x9fa   : > { %2444 = vmatpush3.bf16.msra.mxu1 %v2556_v35 }
 0x9fb   : > { %2445 = vmatprep.subr.bf16.mxu1 %v2672_v8 }
 0x9fe   : > { %2446 = vmatpush3.bf16.msra.mxu1 %v2558_v37 }
 0x9ff   : > { %2447 = vmatprep.subr.bf16.mxu1 %v2672_v8 }
 0xa02   : > { %2448 = vmatpush3.bf16.msra.mxu1 %v2560_v39 }
 0xa03   : > { %2449 = vmatprep.subr.bf16.mxu1 %v2672_v8 }
 0xa06   : > { %2450 = vmatpush3.bf16.msra.mxu1 %v2562_v41 }
 0xa07   : > { %2451 = vmatprep.subr.bf16.mxu1 %v2672_v8 }
 0xa0a   : > { %2452 = vmatpush3.bf16.msra.mxu1 %v2564_v43 }
 0xac0   : > { %v1629_v60 = vpop.f32.mrb[40].mxu1 }
 0xac1   : > { %v1635_v62 = vadd.f32 %v1629_v60, %v1030_v59  ;;  %v2427_v63 = vpop.f32.mrb[41].mxu1 }
 0xac2   : > { %v1632_v1 = vpop.f32.mrb[42].mxu1 }
 0xac3   : > { %v1641_v2 = vadd.f32 %v2172_v61, %v1635_v62  ;;  %v2428_v3 = vpop.f32.mrb[43].mxu1 }
 0xac5   : > { %v3049_v4 = vadd.f32 %v1641_v2, %v2807_v0  ;;  %v2549_v0 = vld [vmem:[%s3220_s8 + $0x8] sm:$0xff]  }
 0xac6   : > { %2432 = vmatpush3.bf16.msra.mxu0 %v2549_v0 }
 0xac7   : > { %v1643_v6 = vsel %vm411_vm0, %v3049_v4, 0.0  ;;  %2457 = vmatprep.subr.bf16.mxu0 %v2672_v8 }
 0xac8   : > { %1644 = vadd.xlane.f32.xlu1 %v1643_v6 }
 0xb55   : > { %v1645_v7 = vpop.xlane.xlu1 %1644 }
 0xb56   : > { %v1646_v9 = vmul.f32 0.03125, %v1645_v7 }
 0xb58   : > { %v1647_v26 = vsub.f32 %v3049_v4, %v1646_v9 }
 0xb5a   : > { %v1648_v10 = vmul.f32 %v1647_v26, %v1647_v26 }
 0xb5c   : > { %v1649_v11 = vsel %vm411_vm0, %v1648_v10, 0.0 }
 0xb5d   : > { %1650 = vadd.xlane.f32.xlu0 %v1649_v11 }
 0xbea   : > { %v1651_v5 = vpop.xlane.xlu0 %1650 }
 0xbeb   : > { %v1652_v17 = vmul.f32 0.03125, %v1651_v5 }
 0xbed   : > { %v1653_v18 = vadd.f32 1e-05, %v1652_v17 }
 0xbef   : > { %2602 = vrsqrt.f32 %v1653_v18 }
 0xbf9   : > { %v2603_v19 = vpop.eup %2602 }
 0xbfa   : > { %v1655_v22 = vmul.f32 %v2603_v19, %v1647_v26 }
 0xbfc   : > { %v1661_v23 = vmul.f32 %v2173_v20, %v1655_v22  ;;  %v1853_v28 = vmul.f32 %v2188_v24, %v1655_v22 }
 0xbfe   : > { %v1667_v25 = vadd.f32 %v2174_v21, %v1661_v23  ;;  %v1859_v32 = vadd.f32 %v2189_v30, %v1853_v28 }
 0xc00   : > { %v1668_v29 = vpack.c.bf16 %v1667_v25, %v1667_v25  ;;  %v1860_v34 = vpack.c.bf16 %v1859_v32, %v1859_v32 }
 0xc02   : > { %2434 = vmatmul.mubr.msk.bf16.vlgmr.msra.gmra.mrb[36].mxu0 %vm411_vm0, %v1668_v29 }
 0xc03   : > { %2458 = vmatpush3.bf16.msra.mxu0 %v2550_v27  ;;  %2461 = vmatprep.mubr.msk.bf16.mxu0 %vm2673_vm1, %v2672_v8 }
 0xc04   : > { %2459 = vmatprep.subr.bf16.mxu0 %v2672_v8 }
 0xc07   : > { %2460 = vmatpush3.bf16.msra.mxu0 %v2551_v31 }
 0xc08   : > { %2465 = vmatprep.subr.bf16.mxu0 %v2672_v8 }
 0xc0a   : > { %2462 = vmatmul.mubr.msk.bf16.vlgmr.msra.gmra.mrb[40].mxu0 %vm411_vm0, %v1860_v34 }
 0xc0b   : > { %2466 = vmatpush3.bf16.msra.mxu0 %v2555_v33  ;;  %2481 = vmatprep.mubr.msk.bf16.mxu0 %vm2673_vm1, %v2672_v8 }
 0xc0c   : > { %2467 = vmatprep.subr.bf16.mxu0 %v2672_v8 }
 0xc0f   : > { %2468 = vmatpush3.bf16.msra.mxu0 %v2557_v36 }
 0xc10   : > { %2469 = vmatprep.subr.bf16.mxu0 %v2672_v8 }
 0xc13   : > { %2470 = vmatpush3.bf16.msra.mxu0 %v2559_v38 }
 0xc14   : > { %2471 = vmatprep.subr.bf16.mxu0 %v2672_v8 }
 0xc17   : > { %2472 = vmatpush3.bf16.msra.mxu0 %v2561_v40 }
 0xc18   : > { %2473 = vmatprep.subr.bf16.mxu0 %v2672_v8 }
 0xc1b   : > { %2474 = vmatpush3.bf16.msra.mxu0 %v2563_v42 }
 0xc1c   : > { %2475 = vmatprep.subr.bf16.mxu0 %v2672_v8 }
 0xc1f   : > { %2476 = vmatpush3.bf16.msra.mxu0 %v2565_v44 }
 0xc20   : > { %2477 = vmatprep.subr.bf16.mxu0 %v2672_v8 }
 0xc23   : > { %2478 = vmatpush3.bf16.msra.mxu0 %v2566_v15 }
 0xc24   : > { %2479 = vmatprep.subr.bf16.mxu0 %v2672_v8  ;;  %v2194_v8 = vld [vmem:[%s3221_s9 + $0x1] ss:$0 sm:$0xff] }
 0xc27   : > { %2480 = vmatpush3.bf16.msra.mxu0 %v2567_v45 }
 0xcd5   : > { %v1727_v47 = vpop.f32.mrb[36].mxu0 }
 0xcd6   : > { %v1728_v48 = vadd.f32 %v2175_v46, %v1727_v47  ;;  %v2435_v49 = vpop.f32.mrb[37].mxu0 }
 0xcd7   : > { %v1730_v50 = vpop.f32.mrb[38].mxu0 }
 0xcd8   : > { %v1734_v51 = vmul.f32 0.70710677, %v1728_v48  ;;  %v2436_v52 = vpop.f32.mrb[39].mxu0  ;;  %v1733_v60 = vmul.f32 0.5, %v1728_v48 }
 0xcda   : > { %2604 = verf.f32 %v1734_v51 }
 0xcdd   : > { %v1920_v53 = vpop.f32.mrb[40].mxu0 }
 0xcde   : > { %v1921_v54 = vadd.f32 %v2194_v8, %v1920_v53  ;;  %v2463_v55 = vpop.f32.mrb[41].mxu0 }
 0xcdf   : > { %v1923_v56 = vpop.f32.mrb[42].mxu0 }
 0xce0   : > { %v1927_v57 = vmul.f32 0.70710677, %v1921_v54  ;;  %v2464_v58 = vpop.f32.mrb[43].mxu0  ;;  %v1926_v2 = vmul.f32 0.5, %v1921_v54 }
 0xce2   : > { %2606 = verf.f32 %v1927_v57 }
 0xce4   : > { %v2605_v59 = vpop.eup %2604 }
 0xce5   : > { %v1736_v61 = vadd.f32 1.0, %v2605_v59 }
 0xce7   : > { %v1737_v62 = vmul.f32 %v1736_v61, %v1733_v60 }
 0xce9   : > { %v1738_v63 = vpack.c.bf16 %v1737_v62, %v1737_v62 }
 0xceb   : > { %2454 = vmatmul.mubr.bf16.vlgmr.msra.gmra.mrb[44].mxu1 %v1738_v63 }
 0xcec   : > { %v2607_v1 = vpop.eup %2606 }
 0xced   : > { %v1929_v3 = vadd.f32 1.0, %v2607_v1 }
 0xcef   : > { %v1930_v6 = vmul.f32 %v1929_v3, %v1926_v2 }
 0xcf1   : > { %v1931_v7 = vpack.c.bf16 %v1930_v6, %v1930_v6 }
 0xcf3   : > { %2482 = vmatmul.mubr.bf16.vlgmr.msra.gmra.mrb[44].mxu0 %v1931_v7 }
 0xdbe   : > { %v1842_v9 = vpop.f32.mrb[44].mxu1 }
 0xdbf   : > { %v2455_v26 = vpop.f32.mrb[45].mxu1  ;;  %v1843_v0 = vadd.f32 %v2179_v12, %v1842_v9 }
 0xdc0   : > { %v1845_v10 = vpop.f32.mrb[46].mxu1 }
 0xdc1   : > { %v2456_v11 = vpop.f32.mrb[47].mxu1 }
 0xdc6   : > { %v2031_v13 = vpop.f32.mrb[44].mxu0 }
 0xdc7   : > { %v2037_v16 = vadd.f32 %v2031_v13, %v1843_v0  ;;  %v2483_v5 = vpop.f32.mrb[45].mxu0 }
 0xdc8   : > { %v2034_v17 = vpop.f32.mrb[46].mxu0 }
 0xdc9   : > { %v2043_v18 = vadd.f32 %v2222_v14, %v2037_v16  ;;  %v2484_v19 = vpop.f32.mrb[47].mxu0 }
 0xdcb   : > { %v2044_v20 = vadd.f32 %v2043_v18, %v3049_v4 }
 0xdcd   : > { %2045 = vst.msk [vmem:[%s404_s16] sm:$0xff] %vm411_vm0, %v2044_v20 }
 0xdce   : > { %2621 = shalt.err (!%p2618_p3)
}
 0xdcf   : > { %s2622_s18 = scalar_lea.hbm %s3169_s0, 128  ;;  %s2626_s20 = scalar_lea.hbm %s3224_s12, 256 }
 0xdd0   : > { %p2623_p4 = scmp.ne.s32.totalorder %s3169_s0, %s2622_s18  ;;  %p2627_p9 = scmp.lt.u32.totalorder %s3169_s0, %s3224_s12 }
 0xdd1   : > { %p2628_p10 = scmp.lt.u32.totalorder %s2626_s20, %s2622_s18  ;;  %p2630_p12 = scmp.lt.u32.totalorder %s2622_s18, %s3169_s0 }
 0xdd2   : > { %p2624_p7 = pnand %p2623_p4, %p2792_p5 }
 0xdd3   : > { %p2629_p11 = por %p2628_p10, %p2627_p9 }
 0xdd4   : > { %p2625_p8 = pneg %p2624_p7 }
 0xdd5   : > { %p2631_p13 = por %p2630_p12, %p2629_p11 }
 0xdd7   : > { %p2632_p0 = pnand %p2631_p13, %p2625_p8 }
 0xdd9   : > { %2635 = shalt.err (!%p2632_p0)
}
 0xdda   : > { %2485 = dma.vmem_to_hbm [thread:$0]  (%p2792_p5), %s3171_s17, 128, %s3169_s0, %s2047_s15  }
 0xddb PF: > { %p2491_p1 = scmp.ge.s32.totalorder %s2670_s24, 2  ;;  %s2072_s1 = sand.u32 1, %s2658_s21  }
 0xddc   : > { %s2073_s25 = scalar_lea.sflag [#allocation4], %s2072_s1 }
 0xddd   : > { %p2488_p2 = pnand %p2491_p1, %p2796_p6 }
 0xddf   : > { %2653 = dma.done.wait (!%p2488_p2), %s2073_s25, 128  }
 0xde0   : > { %2655 = vsyncadd (!%p2488_p2), %s2073_s25, 4294967168  ;;  %p22_p3 = scmp.ge.s32.totalorder %s2779_s27, 4   ;;  %s3253_s21 = smov %s2662_s22 }
 0xde1   : > { %s3254_s22 = smov %s2666_s23  ;;  %s3255_s23 = smov %s2790_s30 }
 0xde2   : > { %s3256_s24 = smov %s2779_s27  ;;  %24 = sbr.rel (!%p22_p3) target bundleno = 6 (0x6), region = 107 }
 0xde9   :  { %2078 = vsyncpa [#allocation4], 1 }
 0xdea   :  { %2080 = vsyncpa [#allocation4 + $0x1], 1 }

</bundles_post_ra>
